<compile_context>
chip_gen: v5e
topology: v5e:2x2
jax: 0.10.0
libtpu: 0.0.40
codegen_flags: <defaults>
</compile_context>

<pallas_src>
import functools

import jax
import jax.numpy as jnp
from jax.experimental import pallas as pl
from jax.experimental.pallas import tpu as pltpu


# ----------------------------------------------------------------------------
# Kernels
# ----------------------------------------------------------------------------
def _per_row_focal(x_ref, t_ref, *, alpha, gamma, total_n, tile_n):
    """Per-row focal values, shape (tile_n, 1) f32; rows >= total_n are 0."""
    i = pl.program_id(0)

    x = x_ref[...].astype(jnp.float32)                  # (TN, C) logits
    t = t_ref[...]                                       # (TN, 1) int32 targets

    # Numerically stable pieces, sharing s = x - max(x):
    #   CE = logsumexp(x) - x[target] = log(sum exp(s)) - s[target]
    m = jnp.max(x, axis=-1, keepdims=True)                               # (TN, 1)
    s = x - m                                                            # (TN, C)
    lse_s = jnp.log(jnp.sum(jnp.exp(s), axis=-1, keepdims=True))         # >= 0
    cols = jax.lax.broadcasted_iota(jnp.int32, s.shape, 1)               # (TN, C)
    s_t = jnp.sum(jnp.where(cols == t, s, 0.0), axis=-1, keepdims=True)  # <= 0
    # clamp: rounding can make CE slightly negative when the target holds the max
    ce = jnp.maximum(lse_s - s_t, 0.0)                                   # (TN, 1)

    # focal modulation
    pt = jnp.exp(-ce)
    one_minus_pt = jnp.maximum(1.0 - pt, 0.0)
    g = float(gamma)
    if g == int(g) and 0 <= int(g) <= 8:
        # integer gamma -> unrolled multiplies (no log/exp pow, no NaN hazard)
        mod = jnp.ones_like(one_minus_pt)
        for _ in range(int(g)):
            mod = mod * one_minus_pt
    else:
        mod = one_minus_pt ** jnp.float32(g)
    focal = jnp.float32(alpha) * mod * ce                                # (TN, 1)

    # Mask rows past the end of the batch (ragged last block).  Must be a
    # SELECT, not arithmetic masking: garbage boundary rows may carry NaN.
    rows = i * tile_n + jax.lax.broadcasted_iota(jnp.int32, focal.shape, 0)
    return jnp.where(rows < total_n, focal, 0.0)


def _focal_partial_sum_kernel(x_ref, t_ref, out_ref, *, alpha, gamma,
                              total_n, tile_n):
    """'mean'/'sum' path: one lane-dense (8, 128) partial-sum slab per tile."""
    focal = _per_row_focal(x_ref, t_ref, alpha=alpha, gamma=gamma,
                           total_n=total_n, tile_n=tile_n)
    tile_total = jnp.sum(focal)                          # scalar f32
    # Every lane carries the tile total; the wrapper reads [:, 0, 0].
    # Full-width unmasked stores, 4 KiB of output per tile.
    out_ref[...] = jnp.full((1, 8, 128), tile_total, dtype=jnp.float32)


def _focal_per_row_kernel(x_ref, t_ref, out_ref, *, alpha, gamma,
                          total_n, tile_n):
    """'none' path: per-row focal values, (tile_n, 1) block of an (N, 1) output."""
    out_ref[...] = _per_row_focal(x_ref, t_ref, alpha=alpha, gamma=gamma,
                                  total_n=total_n, tile_n=tile_n)


# ----------------------------------------------------------------------------
# Tiling / VMEM plan
# ----------------------------------------------------------------------------
def _vmem_capacity_bytes():
    try:
        info = pltpu.get_tpu_info()
        cap = int(getattr(info, "vmem_capacity_bytes", 0))
        if cap > 0:
            return cap
    except Exception:
        pass
    return 64 * 1024 * 1024        # conservative fallback (v7x-sized)


def _plan_tiles(n, c, in_itemsize, reduction):
    """Returns (tile_n, vmem_limit_bytes) sized to this generation's VMEM."""
    cap = _vmem_capacity_bytes()
    # Scoped-VMEM limit: half of physical -> 64 MiB on v5e/v6e (128 MiB parts),
    # 32 MiB on v7x (64 MiB part).
    limit = max(32 * 1024 * 1024, min(cap // 2, 64 * 1024 * 1024))

    granule = 16 if in_itemsize < 4 else 8     # bf16 packs (16, 128)
    narrow = 512                                # (TN, 1) column -> 128-lane tile
    # All VMEM consumers, per row of the tile:
    #   2x double-buffered logit tiles, 2x narrow target buffers,
    #   (+2x narrow output buffers for 'none'), ~3 full-row f32 temporaries
    #   created by the body (f32 upcast / s / exp(s) / iota+select).
    row_bytes = (2 * (c * in_itemsize + narrow)
                 + (2 * narrow if reduction not in ("mean", "sum") else 0)
                 + 3 * c * 4)

    budget = int(limit * 0.75)
    tile = (budget // max(row_bytes, 1)) // granule * granule
    tile = max(granule, min(tile, 8192))
    n_ceil = -(-n // granule) * granule
    tile = min(tile, n_ceil)

    # Escape hatch for very large C: even the minimum tile can overflow the
    # default plan, so grow the limit (capped near physical capacity).
    est = tile * row_bytes + (1 << 20)          # +1 MiB slack for misc scratch
    if est > budget:
        limit = min(max(cap - (16 << 20), limit), max(limit, (est * 4) // 3))
    return tile, int(limit)


# ----------------------------------------------------------------------------
# Wrapper
# ----------------------------------------------------------------------------
def focal_loss(inputs, targets, *, alpha=1.0, gamma=2.0, reduction="mean",
               tile_n=None):
    """inputs: (N, C) float logits (f32 or bf16); targets: (N,) int class ids.

    targets must be valid class ids in [0, C); PyTorch-style ignore_index
    (e.g. -100) is NOT supported.
    """
    n, c = inputs.shape
    itemsize = jnp.dtype(inputs.dtype).itemsize
    granule = 16 if itemsize < 4 else 8
    auto_tile, vmem_limit = _plan_tiles(n, c, itemsize, reduction)
    if tile_n is None:
        tile_n = auto_tile
    assert tile_n % granule == 0, (tile_n, granule)

    num_tiles = pl.cdiv(n, tile_n)
    t2d = targets.astype(jnp.int32).reshape(n, 1)

    compiler_params = pltpu.CompilerParams(
        # Tiles are independent -> shardable across cores.
        dimension_semantics=("parallel",),
        vmem_limit_bytes=vmem_limit,
    )
    in_specs = [
        pl.BlockSpec((tile_n, c), lambda i: (i, 0)),
        pl.BlockSpec((tile_n, 1), lambda i: (i, 0)),
    ]

    if reduction in ("mean", "sum"):
        kernel = functools.partial(
            _focal_partial_sum_kernel, alpha=float(alpha), gamma=float(gamma),
            total_n=n, tile_n=tile_n)
        partials = pl.pallas_call(
            kernel,
            out_shape=jax.ShapeDtypeStruct((num_tiles, 8, 128), jnp.float32),
            grid_spec=pltpu.PrefetchScalarGridSpec(
                num_scalar_prefetch=0,
                grid=(num_tiles,),
                in_specs=in_specs,
                out_specs=pl.BlockSpec((1, 8, 128), lambda i: (i, 0, 0)),
            ),
            compiler_params=compiler_params,
        )(inputs, t2d)
        total = jnp.sum(partials[:, 0, 0])
        if reduction == "mean":
            return total / jnp.float32(n)
        return total

    # reduction == 'none': per-row output.  A narrow (N, 1) column is inherent
    # to this contract (output traffic is only 1/C of the logit stream).
    kernel = functools.partial(
        _focal_per_row_kernel, alpha=float(alpha), gamma=float(gamma),
        total_n=n, tile_n=tile_n)
    out = pl.pallas_call(
        kernel,
        out_shape=jax.ShapeDtypeStruct((n, 1), jnp.float32),
        grid_spec=pltpu.PrefetchScalarGridSpec(
            num_scalar_prefetch=0,
            grid=(num_tiles,),
            in_specs=in_specs,
            out_specs=pl.BlockSpec((tile_n, 1), lambda i: (i, 0)),
        ),
        compiler_params=compiler_params,
    )(inputs, t2d)
    return out[:, 0]


# ----------------------------------------------------------------------------
# Pure-JAX reference + self-test
# ----------------------------------------------------------------------------
def focal_loss_ref(inputs, targets, *, alpha=1.0, gamma=2.0, reduction="mean"):
    logp = jax.nn.log_softmax(inputs.astype(jnp.float32), axis=-1)
    ce = -jnp.take_along_axis(logp, targets[:, None].astype(jnp.int32), axis=-1)[:, 0]
    pt = jnp.exp(-ce)
    focal = alpha * (1.0 - pt) ** gamma * ce
    if reduction == "mean":
        return jnp.mean(focal)
    if reduction == "sum":
        return jnp.sum(focal)
    return focal


if __name__ == "__main__":
    key = jax.random.PRNGKey(0)
    k1, k2 = jax.random.split(key)

    # N deliberately NOT a multiple of the tile size -> exercises ragged blocks.
    N, C = 300, 128
    logits = jax.random.normal(k1, (N, C), dtype=jnp.float32) * 2.0
    targets = jax.random.randint(k2, (N,), 0, C, dtype=jnp.int32)

    # Auto-sized tile (single ragged block).
    out_mean = jax.block_until_ready(focal_loss(logits, targets, reduction="mean"))
    ref_mean = focal_loss_ref(logits, targets, reduction="mean")
    assert jnp.allclose(out_mean, ref_mean, rtol=1e-5, atol=1e-6), (out_mean, ref_mean)

    # Explicit small tile -> multi-tile ragged grid; all three reductions.
    out_mean_t = jax.block_until_ready(
        focal_loss(logits, targets, reduction="mean", tile_n=64))
    assert jnp.allclose(out_mean_t, ref_mean, rtol=1e-5, atol=1e-6), (out_mean_t, ref_mean)

    out_sum = jax.block_until_ready(
        focal_loss(logits, targets, reduction="sum", tile_n=64))
    ref_sum = focal_loss_ref(logits, targets, reduction="sum")
    assert jnp.allclose(out_sum, ref_sum, rtol=1e-5, atol=1e-5), (out_sum, ref_sum)

    out_none = jax.block_until_ready(
        focal_loss(logits, targets, reduction="none", tile_n=64))
    ref_none = focal_loss_ref(logits, targets, reduction="none")
    assert jnp.allclose(out_none, ref_none, rtol=1e-5, atol=1e-6)

    print("KERNEL_OK")
</pallas_src>

<mosaic_0001>
module attributes {stable_mosaic.version = 11 : i64} {
  func.func @_focal_partial_sum_kernel(%arg0: i32, %arg1: memref<304x128xf32, #tpu.memory_space<vmem>>, %arg2: memref<304x1xi32, #tpu.memory_space<vmem>>, %arg3: memref<1x8x128xf32, #tpu.memory_space<vmem>>) attributes {dimension_semantics = [#tpu.dimension_semantics<parallel>], iteration_bounds = array<i64: 1>, scalar_prefetch = 0 : i64, scratch_operands = 0 : i64, tpu.core_type = #tpu.core_type<tc>, window_params = [{transform_indices = @transform_0, window_bounds = array<i64: 304, 128>}, {transform_indices = @transform_1, window_bounds = array<i64: 304, 1>}, {transform_indices = @transform_2, window_bounds = array<i64: 1, 8, 128>}]} {
    %c0 = arith.constant 0 : index
    %c0_0 = arith.constant 0 : index
    %0 = vector.load %arg1[%c0, %c0_0] : memref<304x128xf32, #tpu.memory_space<vmem>>, vector<304x128xf32>
    %c0_1 = arith.constant 0 : index
    %c0_2 = arith.constant 0 : index
    %1 = vector.load %arg2[%c0_1, %c0_2] : memref<304x1xi32, #tpu.memory_space<vmem>>, vector<304x1xi32>
    %cst = arith.constant dense<0xFF800000> : vector<304xf32>
    %2 = vector.multi_reduction <maximumf>, %0, %cst [1] : vector<304x128xf32> to vector<304xf32>
    %3 = vector.shape_cast %2 : vector<304xf32> to vector<304x1xf32>
    %4 = vector.broadcast %3 : vector<304x1xf32> to vector<304x128xf32>
    %5 = arith.subf %0, %4 : vector<304x128xf32>
    %6 = math.exp %5 : vector<304x128xf32>
    %cst_3 = arith.constant dense<0.000000e+00> : vector<304xf32>
    %7 = vector.multi_reduction <add>, %6, %cst_3 [1] : vector<304x128xf32> to vector<304xf32>
    %8 = vector.shape_cast %7 : vector<304xf32> to vector<304x1xf32>
    %9 = math.log %8 : vector<304x1xf32>
    %10 = tpu.iota {dimensions = array<i32: 1>} : vector<304x128xi32>
    %11 = vector.broadcast %1 : vector<304x1xi32> to vector<304x128xi32>
    %12 = arith.cmpi eq, %10, %11 : vector<304x128xi32>
    %cst_4 = arith.constant 0.000000e+00 : f32
    %13 = vector.broadcast %cst_4 : f32 to vector<304x128xf32>
    %14 = arith.select %12, %5, %13 : vector<304x128xi1>, vector<304x128xf32>
    %cst_5 = arith.constant dense<0.000000e+00> : vector<304xf32>
    %15 = vector.multi_reduction <add>, %14, %cst_5 [1] : vector<304x128xf32> to vector<304xf32>
    %16 = vector.shape_cast %15 : vector<304xf32> to vector<304x1xf32>
    %17 = arith.subf %9, %16 : vector<304x1xf32>
    %cst_6 = arith.constant 0.000000e+00 : f32
    %18 = vector.broadcast %cst_6 : f32 to vector<304x1xf32>
    %19 = arith.maximumf %17, %18 : vector<304x1xf32>
    %cst_7 = arith.constant 0.000000e+00 : f32
    %20 = vector.broadcast %cst_7 : f32 to vector<304x1xf32>
    %21 = arith.subf %20, %19 : vector<304x1xf32>
    %22 = math.exp %21 : vector<304x1xf32>
    %cst_8 = arith.constant 1.000000e+00 : f32
    %23 = vector.broadcast %cst_8 : f32 to vector<304x1xf32>
    %24 = arith.subf %23, %22 : vector<304x1xf32>
    %cst_9 = arith.constant 0.000000e+00 : f32
    %25 = vector.broadcast %cst_9 : f32 to vector<304x1xf32>
    %26 = arith.maximumf %24, %25 : vector<304x1xf32>
    %cst_10 = arith.constant 1.000000e+00 : f32
    %27 = vector.broadcast %cst_10 : f32 to vector<304x1xf32>
    %28 = arith.mulf %27, %26 : vector<304x1xf32>
    %29 = arith.mulf %28, %26 : vector<304x1xf32>
    %cst_11 = arith.constant 1.000000e+00 : f32
    %30 = vector.broadcast %cst_11 : f32 to vector<304x1xf32>
    %31 = arith.mulf %30, %29 : vector<304x1xf32>
    %32 = arith.mulf %31, %19 : vector<304x1xf32>
    %c304_i32 = arith.constant 304 : i32
    %33 = arith.muli %arg0, %c304_i32 : i32
    %34 = tpu.iota {dimensions = array<i32: 0>} : vector<304x1xi32>
    %35 = vector.broadcast %33 : i32 to vector<304x1xi32>
    %36 = arith.addi %35, %34 : vector<304x1xi32>
    %c300_i32 = arith.constant 300 : i32
    %37 = vector.broadcast %c300_i32 : i32 to vector<304x1xi32>
    %38 = arith.cmpi slt, %36, %37 : vector<304x1xi32>
    %cst_12 = arith.constant 0.000000e+00 : f32
    %39 = vector.broadcast %cst_12 : f32 to vector<304x1xf32>
    %40 = arith.select %38, %32, %39 : vector<304x1xi1>, vector<304x1xf32>
    %41 = vector.shape_cast %40 : vector<304x1xf32> to vector<1x304x1xf32>
    %cst_13 = arith.constant dense<0.000000e+00> : vector<1xf32>
    %42 = vector.multi_reduction <add>, %41, %cst_13 [1, 2] : vector<1x304x1xf32> to vector<1xf32>
    %43 = vector.shape_cast %42 : vector<1xf32> to vector<1x1x1xf32>
    %44 = vector.extract %43[0, 0, 0] : f32 from vector<1x1x1xf32>
    %45 = vector.broadcast %44 : f32 to vector<1x8x128xf32>
    %c0_14 = arith.constant 0 : index
    %c0_15 = arith.constant 0 : index
    %c0_16 = arith.constant 0 : index
    %46 = vector.load %arg3[%c0_14, %c0_15, %c0_16] : memref<1x8x128xf32, #tpu.memory_space<vmem>>, vector<1x8x128xf32>
    tpu.vector_store %arg3[%c0_14, %c0_15, %c0_16], %45 {strides = array<i32>} : memref<1x8x128xf32, #tpu.memory_space<vmem>>, vector<1x8x128xf32>,
    return
  }
  func.func @transform_0(%arg0: i32) -> (i32, i32) {
    %c0_i32 = arith.constant 0 : i32
    %c0_i32_0 = arith.constant 0 : i32
    return %arg0, %c0_i32 : i32, i32
  }
  func.func @transform_1(%arg0: i32) -> (i32, i32) {
    %c0_i32 = arith.constant 0 : i32
    %c0_i32_0 = arith.constant 0 : i32
    return %arg0, %c0_i32 : i32, i32
  }
  func.func @transform_2(%arg0: i32) -> (i32, i32, i32) {
    %c0_i32 = arith.constant 0 : i32
    %c0_i32_0 = arith.constant 0 : i32
    %c0_i32_1 = arith.constant 0 : i32
    return %arg0, %c0_i32, %c0_i32_0 : i32, i32, i32
  }
}

</mosaic_0001>

<bundles_post_ra>
// kernel: tpu_custom_call.1
= control target key start
LH: loop header
LB: loop body
LE: loop exit
PB: predicated region body
PF: predicated region fallthrough
CT: control target
= control target key end

     0   :  { %s2437_s0 = inlined_call_operand.vmem [shape: f32[300,128], index: 0, kind: input, shape index: {}]   ;;  %s2438_s1 = inlined_call_operand.vmem [shape: s32[300,1], index: 1, kind: input, shape index: {}]   ;;  %s2439_s2 = inlined_call_operand.hbm [shape: f32[1,8,128], index: 2, kind: output, shape index: {}]  }
   0x1   :  { %v1579_v0 = vld [vmem:[%s2437_s0 + $0x20] sm:$0xff]  ;;  %v1584_v1 = vld [vmem:[%s2437_s0 + $0x10] sm:$0xff] }
   0x2   :  { %v1589_v2 = vld [vmem:[%s2437_s0] sm:$0xff]  ;;  %96 = vmax.xlane.f32.xlu2 %v1579_v0  ;;  %92 = vmax.xlane.f32.xlu1 %v1584_v1 }
   0x3   :  { %88 = vmax.xlane.f32.xlu0 %v1589_v2 }
   0x4   :  { %7 = vsyncpa [#allocation3], 0  ;;  %v1597_v3 = vld [vmem:[%s2437_s0 + $0x28] sm:$0xff]  ;;  %v1602_v4 = vld [vmem:[%s2437_s0 + $0x18] sm:$0xff]  ;;  %vm1195_vm14 = vcmask 7168   ;;  %s1289_s19 = sshll.u32 %s2439_s2, 4  ;;  %s1290_s19 = int_to_ptr.hbm [resolvable:$true] %s1289_s19 }
   0x5   :  { %v1607_v5 = vld [vmem:[%s2437_s0 + $0x8] sm:$0xff]  ;;  %v1615_v6 = vld [vmem:[%s2437_s0 + $0x40] sm:$0xff]  ;;  %v1620_v7 = vld [vmem:[%s2437_s0 + $0x38] sm:$0xff]  ;;  %s1560_s20 = smov [#allocation2]  }
   0x6   :  { %v1625_v8 = vld [vmem:[%s2437_s0 + $0x30] sm:$0xff]  ;;  %v1633_v9 = vld [vmem:[%s2437_s0 + $0x58] sm:$0xff]  ;;  %v1643_v11 = vld [vmem:[%s2437_s0 + $0x48] sm:$0xff]  ;;  %s1287_s21 = sshll.u32 %s1560_s20, 4  ;;  %s1288_s21 = int_to_ptr.vmem [resolvable:$true] %s1287_s21 }
   0x7   :  { %v1638_v10 = vld [vmem:[%s2437_s0 + $0x50] sm:$0xff]  ;;  %v1656_v13 = vld [vmem:[%s2437_s0 + $0x68] sm:$0xff]  ;;  %v1661_v14 = vld [vmem:[%s2437_s0 + $0x60] sm:$0xff] }
   0x8   :  { %v1651_v12 = vld [vmem:[%s2437_s0 + $0x70] sm:$0xff]  ;;  %v1669_v15 = vld [vmem:[%s2437_s0 + $0x88] sm:$0xff]  ;;  %v1674_v16 = vld [vmem:[%s2437_s0 + $0x80] sm:$0xff] }
   0x9   :  { %v1679_v17 = vld [vmem:[%s2437_s0 + $0x78] sm:$0xff]  ;;  %v1687_v18 = vld [vmem:[%s2437_s0 + $0xa0] sm:$0xff]  ;;  %v1697_v20 = vld [vmem:[%s2437_s0 + $0x90] sm:$0xff] }
   0xa   :  { %98 = vmax.xlane.f32.xlu2 %v1597_v3  ;;  %94 = vmax.xlane.f32.xlu1 %v1602_v4  ;;  %v1692_v19 = vld [vmem:[%s2437_s0 + $0x98] sm:$0xff]  ;;  %v1710_v22 = vld [vmem:[%s2437_s0 + $0xb0] sm:$0xff]  ;;  %v1715_v23 = vld [vmem:[%s2437_s0 + $0xa8] sm:$0xff] }
   0xb   :  { %90 = vmax.xlane.f32.xlu0 %v1607_v5  ;;  %v1705_v21 = vld [vmem:[%s2437_s0 + $0xb8] sm:$0xff]  ;;  %v1723_v24 = vld [vmem:[%s2437_s0 + $0xd0] sm:$0xff]  ;;  %v1728_v25 = vld [vmem:[%s2437_s0 + $0xc8] sm:$0xff] }
   0xc   :  { %v1733_v26 = vld [vmem:[%s2437_s0 + $0xc0] sm:$0xff]  ;;  %v1741_v27 = vld [vmem:[%s2437_s0 + $0xe8] sm:$0xff]  ;;  %v1751_v29 = vld [vmem:[%s2437_s0 + $0xd8] sm:$0xff] }
   0xd   :  { %v1746_v28 = vld [vmem:[%s2437_s0 + $0xe0] sm:$0xff]  ;;  %v1764_v31 = vld [vmem:[%s2437_s0 + $0xf8] sm:$0xff]  ;;  %v1769_v32 = vld [vmem:[%s2437_s0 + $0xf0] sm:$0xff] }
   0xe   :  { %v1759_v30 = vld [vmem:[%s2437_s0 + $0x100] sm:$0xff]  ;;  %v1777_v33 = vld [vmem:[%s2437_s0 + $0x118] sm:$0xff]  ;;  %v1782_v34 = vld [vmem:[%s2437_s0 + $0x110] sm:$0xff] }
   0xf   :  { %v1787_v35 = vld [vmem:[%s2437_s0 + $0x108] sm:$0xff]  ;;  %v1800_v37 = vld [vmem:[%s2437_s0 + $0x120] sm:$0xff] }
  0x10   :  { %v1795_v36 = vld [vmem:[%s2437_s0 + $0x128] sm:$0xff] }
  0x12   :  { %104 = vmax.xlane.f32.xlu2 %v1615_v6  ;;  %102 = vmax.xlane.f32.xlu1 %v1620_v7 }
  0x13   :  { %100 = vmax.xlane.f32.xlu0 %v1625_v8 }
  0x1a   :  { %110 = vmax.xlane.f32.xlu2 %v1633_v9  ;;  %108 = vmax.xlane.f32.xlu1 %v1638_v10 }
  0x1b   :  { %106 = vmax.xlane.f32.xlu0 %v1643_v11 }
  0x22   :  { %116 = vmax.xlane.f32.xlu2 %v1651_v12  ;;  %114 = vmax.xlane.f32.xlu1 %v1656_v13 }
  0x23   :  { %112 = vmax.xlane.f32.xlu0 %v1661_v14 }
  0x2a   :  { %122 = vmax.xlane.f32.xlu2 %v1669_v15  ;;  %120 = vmax.xlane.f32.xlu1 %v1674_v16 }
  0x2b   :  { %118 = vmax.xlane.f32.xlu0 %v1679_v17 }
  0x32   :  { %128 = vmax.xlane.f32.xlu2 %v1687_v18  ;;  %126 = vmax.xlane.f32.xlu1 %v1692_v19 }
  0x33   :  { %124 = vmax.xlane.f32.xlu0 %v1697_v20 }
  0x3a   :  { %134 = vmax.xlane.f32.xlu2 %v1705_v21  ;;  %132 = vmax.xlane.f32.xlu1 %v1710_v22 }
  0x3b   :  { %130 = vmax.xlane.f32.xlu0 %v1715_v23 }
  0x42   :  { %140 = vmax.xlane.f32.xlu2 %v1723_v24  ;;  %138 = vmax.xlane.f32.xlu1 %v1728_v25 }
  0x43   :  { %136 = vmax.xlane.f32.xlu0 %v1733_v26 }
  0x4a   :  { %146 = vmax.xlane.f32.xlu2 %v1741_v27  ;;  %144 = vmax.xlane.f32.xlu1 %v1746_v28 }
  0x4b   :  { %142 = vmax.xlane.f32.xlu0 %v1751_v29 }
  0x52   :  { %152 = vmax.xlane.f32.xlu2 %v1759_v30  ;;  %150 = vmax.xlane.f32.xlu1 %v1764_v31 }
  0x53   :  { %148 = vmax.xlane.f32.xlu0 %v1769_v32 }
  0x5a   :  { %158 = vmax.xlane.f32.xlu2 %v1777_v33  ;;  %156 = vmax.xlane.f32.xlu1 %v1782_v34 }
  0x5b   :  { %154 = vmax.xlane.f32.xlu0 %v1787_v35 }
  0x62   :  { %162 = vmax.xlane.f32.xlu1 %v1795_v36 }
  0x63   :  { %160 = vmax.xlane.f32.xlu0 %v1800_v37 }
  0x75   :  { %v97_v38 = vpop.xlane.xlu2 %96  ;;  %v93_v39 = vpop.xlane.xlu1 %92 }
  0x76   :  { %v1805_v40 = vsub.f32 %v1584_v1, %v93_v39  ;;  %v89_v41 = vpop.xlane.xlu0 %88  ;;  %v1825_v56 = vsub.f32 %v1579_v0, %v97_v38 }
  0x77   :  { %v1808_v42 = vsub.f32 %v1589_v2, %v89_v41 }
  0x78   :  { %v206_v43 = vmul.f32 1.442695, %v1805_v40  ;;  %v210_v63 = vmul.f32 1.442695, %v1825_v56 }
  0x79   :  { %v202_v44 = vmul.f32 1.442695, %v1808_v42 }
  0x7a   :  { %1305 = vpow2.f32 %v206_v43 }
  0x7b   :  { %1307 = vpow2.f32 %v202_v44 }
  0x7d   :  { %v99_v45 = vpop.xlane.xlu2 %98  ;;  %v95_v46 = vpop.xlane.xlu1 %94 }
  0x7e   :  { %v1813_v47 = vsub.f32 %v1597_v3, %v99_v45  ;;  %v1816_v48 = vsub.f32 %v1602_v4, %v95_v46  ;;  %v91_v49 = vpop.xlane.xlu0 %90 }
  0x7f   :  { %v1819_v50 = vsub.f32 %v1607_v5, %v91_v49 }
  0x80   :  { %v212_v51 = vmul.f32 1.442695, %v1813_v47  ;;  %v208_v52 = vmul.f32 1.442695, %v1816_v48  ;;  %v1306_v53 = vpop.eup %1305 }
  0x81   :  { %v204_v54 = vmul.f32 1.442695, %v1819_v50  ;;  %v1308_v55 = vpop.eup %1307  ;;  %282 = vadd.xlane.f32.xlu1 %v1306_v53 }
  0x82   :  { %1309 = vpow2.f32 %v212_v51  ;;  %278 = vadd.xlane.f32.xlu2 %v1308_v55 }
  0x83   :  { %1311 = vpow2.f32 %v208_v52 }
  0x84   :  { %1313 = vpow2.f32 %v204_v54 }
  0x85   :  { %v105_v57 = vpop.xlane.xlu2 %104  ;;  %v103_v58 = vpop.xlane.xlu1 %102 }
  0x86   :  { %v1828_v59 = vsub.f32 %v1615_v6, %v105_v57  ;;  %v101_v60 = vpop.xlane.xlu0 %100  ;;  %v1837_v0 = vsub.f32 %v1620_v7, %v103_v58 }
  0x87   :  { %v1831_v61 = vsub.f32 %v1625_v8, %v101_v60 }
  0x88   :  { %v1310_v62 = vpop.eup %1309  ;;  %v218_v1 = vmul.f32 1.442695, %v1828_v59  ;;  %v216_v6 = vmul.f32 1.442695, %v1837_v0 }
  0x89   :  { %v1312_v2 = vpop.eup %1311  ;;  %v214_v3 = vmul.f32 1.442695, %v1831_v61  ;;  %288 = vadd.xlane.f32.xlu1 %v1310_v62 }
  0x8a   :  { %v1314_v4 = vpop.eup %1313  ;;  %1315 = vpow2.f32 %v218_v1  ;;  %284 = vadd.xlane.f32.xlu2 %v1312_v2 }
  0x8b   :  { %1317 = vpow2.f32 %v214_v3  ;;  %280 = vadd.xlane.f32.xlu0 %v1314_v4 }
  0x8c   :  { %1319 = vpow2.f32 %v210_v63 }
  0x8d   :  { %v111_v5 = vpop.xlane.xlu2 %110  ;;  %v109_v8 = vpop.xlane.xlu1 %108  ;;  %1321 = vpow2.f32 %v216_v6 }
  0x8e   :  { %v1841_v38 = vsub.f32 %v1633_v9, %v111_v5  ;;  %v107_v39 = vpop.xlane.xlu0 %106  ;;  %v1849_v46 = vsub.f32 %v1638_v10, %v109_v8 }
  0x8f   :  { %v1844_v41 = vsub.f32 %v1643_v11, %v107_v39 }
  0x90   :  { %v1316_v7 = vpop.eup %1315  ;;  %v224_v43 = vmul.f32 1.442695, %v1841_v38  ;;  %v222_v11 = vmul.f32 1.442695, %v1849_v46 }
  0x91   :  { %v1318_v44 = vpop.eup %1317  ;;  %v220_v45 = vmul.f32 1.442695, %v1844_v41  ;;  %294 = vadd.xlane.f32.xlu1 %v1316_v7 }
  0x92   :  { %v1320_v49 = vpop.eup %1319  ;;  %1323 = vpow2.f32 %v224_v43  ;;  %290 = vadd.xlane.f32.xlu2 %v1318_v44 }
  0x93   :  { %1325 = vpow2.f32 %v220_v45  ;;  %286 = vadd.xlane.f32.xlu0 %v1320_v49  ;;  %v1322_v54 = vpop.eup %1321 }
  0x94   :  { %1327 = vpow2.f32 %v222_v11 }
  0x95   :  { %v117_v9 = vpop.xlane.xlu2 %116  ;;  %v115_v51 = vpop.xlane.xlu1 %114 }
  0x96   :  { %v1853_v52 = vsub.f32 %v1651_v12, %v117_v9  ;;  %v113_v53 = vpop.xlane.xlu0 %112  ;;  %v1861_v62 = vsub.f32 %v1656_v13, %v115_v51 }
  0x97   :  { %v1856_v55 = vsub.f32 %v1661_v14, %v113_v53 }
  0x98   :  { %v1324_v10 = vpop.eup %1323  ;;  %v230_v57 = vmul.f32 1.442695, %v1853_v52  ;;  %v228_v63 = vmul.f32 1.442695, %v1861_v62 }
  0x99   :  { %v1326_v58 = vpop.eup %1325  ;;  %v226_v60 = vmul.f32 1.442695, %v1856_v55  ;;  %300 = vadd.xlane.f32.xlu1 %v1324_v10 }
  0x9a   :  { %1329 = vpow2.f32 %v230_v57  ;;  %296 = vadd.xlane.f32.xlu2 %v1326_v58  ;;  %v1328_v3 = vpop.eup %1327 }
  0x9b   :  { %1331 = vpow2.f32 %v226_v60  ;;  %292 = vadd.xlane.f32.xlu0 %v1322_v54 }
  0x9c   :  { %1333 = vpow2.f32 %v228_v63 }
  0x9d   :  { %v123_v12 = vpop.xlane.xlu2 %122  ;;  %v121_v14 = vpop.xlane.xlu1 %120 }
  0x9e   :  { %v1865_v1 = vsub.f32 %v1669_v15, %v123_v12  ;;  %v119_v2 = vpop.xlane.xlu0 %118  ;;  %v1873_v39 = vsub.f32 %v1674_v16, %v121_v14 }
  0x9f   :  { %v1868_v4 = vsub.f32 %v1679_v17, %v119_v2 }
  0xa0   :  { %v1330_v5 = vpop.eup %1329  ;;  %v236_v13 = vmul.f32 1.442695, %v1865_v1  ;;  %v234_v7 = vmul.f32 1.442695, %v1873_v39 }
  0xa1   :  { %v1332_v6 = vpop.eup %1331  ;;  %v232_v8 = vmul.f32 1.442695, %v1868_v4  ;;  %306 = vadd.xlane.f32.xlu1 %v1330_v5 }
  0xa2   :  { %1335 = vpow2.f32 %v236_v13  ;;  %302 = vadd.xlane.f32.xlu2 %v1332_v6  ;;  %v1334_v45 = vpop.eup %1333 }
  0xa3   :  { %1337 = vpow2.f32 %v232_v8  ;;  %298 = vadd.xlane.f32.xlu0 %v1328_v3 }
  0xa4   :  { %1339 = vpow2.f32 %v234_v7 }
  0xa5   :  { %v129_v15 = vpop.xlane.xlu2 %128  ;;  %v127_v17 = vpop.xlane.xlu1 %126 }
  0xa6   :  { %v1877_v43 = vsub.f32 %v1687_v18, %v129_v15  ;;  %v125_v44 = vpop.xlane.xlu0 %124  ;;  %v1885_v53 = vsub.f32 %v1692_v19, %v127_v17 }
  0xa7   :  { %v1880_v49 = vsub.f32 %v1697_v20, %v125_v44 }
  0xa8   :  { %v1336_v9 = vpop.eup %1335  ;;  %v242_v16 = vmul.f32 1.442695, %v1877_v43  ;;  %v240_v54 = vmul.f32 1.442695, %v1885_v53 }
  0xa9   :  { %v1338_v11 = vpop.eup %1337  ;;  %v238_v51 = vmul.f32 1.442695, %v1880_v49  ;;  %312 = vadd.xlane.f32.xlu1 %v1336_v9 }
  0xaa   :  { %1341 = vpow2.f32 %v242_v16  ;;  %308 = vadd.xlane.f32.xlu2 %v1338_v11  ;;  %v1340_v58 = vpop.eup %1339 }
  0xab   :  { %1343 = vpow2.f32 %v238_v51  ;;  %304 = vadd.xlane.f32.xlu0 %v1334_v45 }
  0xac   :  { %1345 = vpow2.f32 %v240_v54 }
  0xad   :  { %v135_v18 = vpop.xlane.xlu2 %134  ;;  %v133_v20 = vpop.xlane.xlu1 %132 }
  0xae   :  { %v1889_v10 = vsub.f32 %v1705_v21, %v135_v18  ;;  %v131_v57 = vpop.xlane.xlu0 %130  ;;  %v1897_v2 = vsub.f32 %v1710_v22, %v133_v20 }
  0xaf   :  { %v1892_v60 = vsub.f32 %v1715_v23, %v131_v57 }
  0xb0   :  { %v1342_v12 = vpop.eup %1341  ;;  %v248_v19 = vmul.f32 1.442695, %v1889_v10  ;;  %v246_v3 = vmul.f32 1.442695, %v1897_v2 }
  0xb1   :  { %v1344_v63 = vpop.eup %1343  ;;  %v244_v14 = vmul.f32 1.442695, %v1892_v60  ;;  %318 = vadd.xlane.f32.xlu1 %v1342_v12 }
  0xb2   :  { %1347 = vpow2.f32 %v248_v19  ;;  %314 = vadd.xlane.f32.xlu2 %v1344_v63  ;;  %v1346_v6 = vpop.eup %1345 }
  0xb3   :  { %1349 = vpow2.f32 %v244_v14  ;;  %310 = vadd.xlane.f32.xlu0 %v1340_v58 }
  0xb4   :  { %1351 = vpow2.f32 %v246_v3 }
  0xb5   :  { %v141_v21 = vpop.xlane.xlu2 %140  ;;  %v139_v23 = vpop.xlane.xlu1 %138 }
  0xb6   :  { %v1901_v5 = vsub.f32 %v1723_v24, %v141_v21  ;;  %v137_v13 = vpop.xlane.xlu0 %136  ;;  %v1909_v44 = vsub.f32 %v1728_v25, %v139_v23 }
  0xb7   :  { %v1904_v8 = vsub.f32 %v1733_v26, %v137_v13 }
  0xb8   :  { %v1348_v15 = vpop.eup %1347  ;;  %v254_v22 = vmul.f32 1.442695, %v1901_v5  ;;  %v252_v45 = vmul.f32 1.442695, %v1909_v44 }
  0xb9   :  { %v1350_v7 = vpop.eup %1349  ;;  %v250_v17 = vmul.f32 1.442695, %v1904_v8  ;;  %324 = vadd.xlane.f32.xlu1 %v1348_v15 }
  0xba   :  { %1353 = vpow2.f32 %v254_v22  ;;  %320 = vadd.xlane.f32.xlu2 %v1350_v7  ;;  %v1352_v11 = vpop.eup %1351 }
  0xbb   :  { %1355 = vpow2.f32 %v250_v17  ;;  %316 = vadd.xlane.f32.xlu0 %v1346_v6 }
  0xbc   :  { %1357 = vpow2.f32 %v252_v45 }
  0xbd   :  { %v147_v24 = vpop.xlane.xlu2 %146  ;;  %v145_v26 = vpop.xlane.xlu1 %144 }
  0xbe   :  { %v1913_v9 = vsub.f32 %v1741_v27, %v147_v24  ;;  %v143_v16 = vpop.xlane.xlu0 %142  ;;  %v1921_v57 = vsub.f32 %v1746_v28, %v145_v26 }
  0xbf   :  { %v1916_v51 = vsub.f32 %v1751_v29, %v143_v16 }
  0xc0   :  { %v1354_v18 = vpop.eup %1353  ;;  %v260_v25 = vmul.f32 1.442695, %v1913_v9  ;;  %v258_v58 = vmul.f32 1.442695, %v1921_v57 }
  0xc1   :  { %v1356_v54 = vpop.eup %1355  ;;  %v256_v20 = vmul.f32 1.442695, %v1916_v51  ;;  %330 = vadd.xlane.f32.xlu1 %v1354_v18 }
  0xc2   :  { %1359 = vpow2.f32 %v260_v25  ;;  %326 = vadd.xlane.f32.xlu2 %v1356_v54  ;;  %v1358_v63 = vpop.eup %1357 }
  0xc3   :  { %1361 = vpow2.f32 %v256_v20  ;;  %322 = vadd.xlane.f32.xlu0 %v1352_v11 }
  0xc4   :  { %1363 = vpow2.f32 %v258_v58 }
  0xc5   :  { %v153_v27 = vpop.xlane.xlu2 %152  ;;  %v151_v29 = vpop.xlane.xlu1 %150 }
  0xc6   :  { %v1925_v12 = vsub.f32 %v1759_v30, %v153_v27  ;;  %v149_v19 = vpop.xlane.xlu0 %148  ;;  %v1933_v13 = vsub.f32 %v1764_v31, %v151_v29  ;;  %v1559_v30 = vmov 0  }
  0xc7   :  { %v1928_v14 = vsub.f32 %v1769_v32, %v149_v19  ;;  %1302 = vset.pattern.permute.xlu1 %v1559_v30  ;;  %1303 = vset.pattern.permute.xlu2 %v1559_v30 }
  0xc8   :  { %v1360_v21 = vpop.eup %1359  ;;  %v266_v28 = vmul.f32 1.442695, %v1925_v12  ;;  %v264_v6 = vmul.f32 1.442695, %v1933_v13  ;;  %1304 = vset.pattern.permute.xlu0 %v1559_v30  ;;  %v52_v30 = vld [vmem:[%s2438_s1 + $0x10] sm:$0xff] }
  0xc9   :  { %v1362_v3 = vpop.eup %1361  ;;  %v262_v23 = vmul.f32 1.442695, %v1928_v14  ;;  %336 = vadd.xlane.f32.xlu1 %v1360_v21  ;;  %v50_v21 = vld [vmem:[%s2438_s1] sm:$0xff] }
  0xca   :  { %1365 = vpow2.f32 %v266_v28  ;;  %332 = vadd.xlane.f32.xlu2 %v1362_v3  ;;  %v1364_v17 = vpop.eup %1363  ;;  %v51_v3 = vld [vmem:[%s2438_s1 + $0x8] sm:$0xff] }
  0xcb   :  { %1367 = vpow2.f32 %v262_v23  ;;  %328 = vadd.xlane.f32.xlu0 %v1358_v63  ;;  %v54_v23 = vld [vmem:[%s2438_s1 + $0x20] sm:$0xff] }
  0xcc   :  { %1369 = vpow2.f32 %v264_v6 }
  0xcd   :  { %v159_v32 = vpop.xlane.xlu2 %158  ;;  %v157_v15 = vpop.xlane.xlu1 %156 }
  0xce   :  { %v1937_v22 = vsub.f32 %v1777_v33, %v159_v32  ;;  %v155_v7 = vpop.xlane.xlu0 %154  ;;  %v1945_v11 = vsub.f32 %v1782_v34, %v157_v15 }
  0xcf   :  { %v1940_v31 = vsub.f32 %v1787_v35, %v155_v7  ;;  %v53_v7 = vld [vmem:[%s2438_s1 + $0x18] sm:$0xff] }
  0xd0   :  { %v1366_v24 = vpop.eup %1365  ;;  %v272_v45 = vmul.f32 1.442695, %v1937_v22  ;;  %v270_v33 = vmul.f32 1.442695, %v1945_v11 }
  0xd1   :  { %v1368_v26 = vpop.eup %1367  ;;  %v268_v16 = vmul.f32 1.442695, %v1940_v31  ;;  %342 = vadd.xlane.f32.xlu1 %v1366_v24  ;;  %v59_v24 = vld [vmem:[%s2438_s1 + $0x48] sm:$0xff] }
  0xd2   :  { %1371 = vpow2.f32 %v272_v45  ;;  %338 = vadd.xlane.f32.xlu2 %v1368_v26  ;;  %v1370_v35 = vpop.eup %1369 }
  0xd3   :  { %1373 = vpow2.f32 %v268_v16  ;;  %334 = vadd.xlane.f32.xlu0 %v1364_v17  ;;  %v56_v17 = vld [vmem:[%s2438_s1 + $0x30] sm:$0xff] }
  0xd4   :  { %1375 = vpow2.f32 %v270_v33  ;;  %v55_v33 = vld [vmem:[%s2438_s1 + $0x28] sm:$0xff] }
  0xd5   :  { %v163_v54 = vpop.xlane.xlu1 %162 }
  0xd6   :  { %v161_v18 = vpop.xlane.xlu0 %160  ;;  %v1953_v34 = vsub.f32 %v1795_v36, %v163_v54 }
  0xd7   :  { %v1949_v25 = vsub.f32 %v1800_v37, %v161_v18  ;;  %v58_v18 = vld [vmem:[%s2438_s1 + $0x40] sm:$0xff] }
  0xd8   :  { %v1372_v20 = vpop.eup %1371  ;;  %v276_v29 = vmul.f32 1.442695, %v1953_v34 }
  0xd9   :  { %v1374_v27 = vpop.eup %1373  ;;  %v274_v58 = vmul.f32 1.442695, %v1949_v25  ;;  %348 = vadd.xlane.f32.xlu1 %v1372_v20 }
  0xda   :  { %344 = vadd.xlane.f32.xlu2 %v1374_v27  ;;  %v1376_v19 = vpop.eup %1375 }
  0xdb   :  { %1377 = vpow2.f32 %v274_v58  ;;  %340 = vadd.xlane.f32.xlu0 %v1370_v35  ;;  %v62_v35 = vld [vmem:[%s2438_s1 + $0x60] sm:$0xff]  ;;  %v57_v58 = vld [vmem:[%s2438_s1 + $0x38] sm:$0xff] }
  0xdc   :  { %1379 = vpow2.f32 %v276_v29  ;;  %v61_v29 = vld [vmem:[%s2438_s1 + $0x58] sm:$0xff] }
  0xe1   :  { %v1378_v63 = vpop.eup %1377 }
  0xe2   :  { %350 = vadd.xlane.f32.xlu2 %v1378_v63  ;;  %v1380_v37 = vpop.eup %1379 }
  0xe3   :  { %346 = vadd.xlane.f32.xlu0 %v1376_v19 }
  0xeb   :  { %352 = vadd.xlane.f32.xlu0 %v1380_v37 }
  0xf2   :  { %433 = vperm.xlu1 %1302, %v50_v21   ;;  %v60_v21 = vld [vmem:[%s2438_s1 + $0x50] sm:$0xff] }
  0xf4   :  { %v1959_v28 = vpop.xlane.xlu1 %282 }
  0xf5   :  { %v1961_v36 = vpop.xlane.xlu2 %278 }
  0xfa   :  { %436 = vperm.xlu2 %1303, %v51_v3   ;;  %445 = vperm.xlu1 %1302, %v54_v23   ;;  %v64_v3 = vld [vmem:[%s2438_s1 + $0x70] sm:$0xff] }
  0xfc   :  { %v1972_v32 = vpop.xlane.xlu1 %288 }
  0xfd   :  { %v1974_v6 = vpop.xlane.xlu2 %284 }
  0xfe   :  { %v1976_v15 = vpop.xlane.xlu0 %280 }
  0xff   :  { %439 = vperm.xlu0 %1304, %v52_v30   ;;  %1381 = vlog2.f32 %v1976_v15  ;;  %v84_v15 = vld [vmem:[%s2438_s1 + $0x110] sm:$0xff] }
 0x100   :  { %1383 = vlog2.f32 %v1961_v36 }
 0x101   :  { %1385 = vlog2.f32 %v1974_v6 }
 0x102   :  { %442 = vperm.xlu2 %1303, %v53_v7   ;;  %451 = vperm.xlu1 %1302, %v56_v17   ;;  %1387 = vlog2.f32 %v1959_v28 }
 0x104   :  { %v1987_v45 = vpop.xlane.xlu1 %294 }
 0x105   :  { %v1989_v26 = vpop.xlane.xlu2 %290 }
 0x106   :  { %v1991_v16 = vpop.xlane.xlu0 %286 }
 0x107   :  { %460 = vperm.xlu0 %1304, %v59_v24  }
 0x10a   :  { %448 = vperm.xlu2 %1303, %v55_v33   ;;  %457 = vperm.xlu1 %1302, %v58_v18  }
 0x10c   :  { %v2002_v54 = vpop.xlane.xlu1 %300 }
 0x10d   :  { %v2004_v20 = vpop.xlane.xlu2 %296 }
 0x10e   :  { %v2006_v27 = vpop.xlane.xlu0 %292 }
 0x10f   :  { %469 = vperm.xlu0 %1304, %v62_v35  }
 0x112   :  { %454 = vperm.xlu2 %1303, %v57_v58   ;;  %466 = vperm.xlu1 %1302, %v61_v29  }
 0x114   :  { %v2018_v37 = vpop.xlane.xlu1 %306 }
 0x115   :  { %v2014_v19 = vpop.xlane.xlu2 %302 }
 0x116   :  { %v2016_v63 = vpop.xlane.xlu0 %298 }
 0x11a   :  { %463 = vperm.xlu2 %1303, %v60_v21   ;;  %475 = vperm.xlu1 %1302, %v64_v3  }
 0x11c   :  { %v2030_v7 = vpop.xlane.xlu1 %312 }
 0x11d   :  { %v2026_v23 = vpop.xlane.xlu2 %308  ;;  %2442 = vst [vmem:[#allocation6_spill] sm:$0xff] %v2030_v7 }
 0x11e   :  { %2441 = vst [vmem:[#allocation5_spill] sm:$0xff] %v2026_v23  ;;  %v2028_v30 = vpop.xlane.xlu0 %304 }
 0x124   :  { %v2036_v33 = vpop.xlane.xlu1 %318 }
 0x125   :  { %v2032_v17 = vpop.xlane.xlu2 %314  ;;  %2445 = vst [vmem:[#allocation9_spill] sm:$0xff] %v2036_v33 }
 0x126   :  { %2443 = vst [vmem:[#allocation7_spill] sm:$0xff] %v2032_v17  ;;  %v2034_v24 = vpop.xlane.xlu0 %310 }
 0x127   :  { %2444 = vst [vmem:[#allocation8_spill] sm:$0xff] %v2034_v24 }
 0x12c   :  { %v2042_v58 = vpop.xlane.xlu1 %324 }
 0x12d   :  { %v2038_v18 = vpop.xlane.xlu2 %320  ;;  %2448 = vst [vmem:[#allocation12_spill] sm:$0xff] %v2042_v58 }
 0x12e   :  { %2446 = vst [vmem:[#allocation10_spill] sm:$0xff] %v2038_v18  ;;  %v2040_v35 = vpop.xlane.xlu0 %316 }
 0x12f   :  { %2447 = vst [vmem:[#allocation11_spill] sm:$0xff] %v2040_v35 }
 0x134   :  { %v2050_v23 = vpop.xlane.xlu1 %330 }
 0x135   :  { %v2044_v29 = vpop.xlane.xlu2 %326  ;;  %2452 = vst [vmem:[#allocation16_spill] sm:$0xff] %v2050_v23 }
 0x136   :  { %2449 = vst [vmem:[#allocation13_spill] sm:$0xff] %v2044_v29  ;;  %v2046_v21 = vpop.xlane.xlu0 %322 }
 0x137   :  { %2450 = vst [vmem:[#allocation14_spill] sm:$0xff] %v2046_v21  ;;  %v2440_v21 = vlaneseq }
 0x13c   :  { %v2056_v24 = vpop.xlane.xlu1 %336 }
 0x13d   :  { %v2048_v3 = vpop.xlane.xlu2 %332 }
 0x13e   :  { %2451 = vst [vmem:[#allocation15_spill] sm:$0xff] %v2048_v3  ;;  %v2052_v7 = vpop.xlane.xlu0 %328  ;;  %v2069_v3 = vand.u32 127, %v2440_v21 }
 0x13f   :  { %2453 = vst [vmem:[#allocation17_spill] sm:$0xff] %v2052_v7 }
 0x144   :  { %v2062_v35 = vpop.xlane.xlu1 %342 }
 0x145   :  { %v2054_v17 = vpop.xlane.xlu2 %338  ;;  %2457 = vst [vmem:[#allocation21_spill] sm:$0xff] %v2062_v35 }
 0x146   :  { %2454 = vst [vmem:[#allocation18_spill] sm:$0xff] %v2054_v17  ;;  %v2058_v33 = vpop.xlane.xlu0 %334 }
 0x147   :  { %2455 = vst [vmem:[#allocation19_spill] sm:$0xff] %v2058_v33 }
 0x14c   :  { %v2071_v23 = vpop.xlane.xlu1 %348 }
 0x14d   :  { %v2060_v18 = vpop.xlane.xlu2 %344  ;;  %2460 = vst [vmem:[#allocation24_spill] sm:$0xff] %v2071_v23 }
 0x14e   :  { %2456 = vst [vmem:[#allocation20_spill] sm:$0xff] %v2060_v18  ;;  %v2064_v58 = vpop.xlane.xlu0 %340 }
 0x14f   :  { %2458 = vst [vmem:[#allocation22_spill] sm:$0xff] %v2064_v58 }
 0x155   :  { %v2066_v29 = vpop.xlane.xlu2 %350 }
 0x156   :  { %2459 = vst [vmem:[#allocation23_spill] sm:$0xff] %v2066_v29  ;;  %v2073_v7 = vpop.xlane.xlu0 %346 }
 0x157   :  { %2461 = vst [vmem:[#allocation25_spill] sm:$0xff] %v2073_v7 }
 0x15d   :  { %v437_v17 = vpop.permute.xlu2 %436 }
 0x15e   :  { %vm547_vm0 = vcmp.eq.s32.totalorder %v2069_v3, %v437_v17  ;;  %v2080_v21 = vpop.xlane.xlu0 %352 }
 0x15f   :  { %v585_v33 = vsel %vm547_vm0, %v1819_v50, 0.0 }
 0x160   :  { %624 = vadd.xlane.f32.xlu1 %v585_v33 }
 0x164   :  { %v434_v18 = vpop.permute.xlu1 %433 }
 0x165   :  { %vm546_vm1 = vcmp.eq.s32.totalorder %v2069_v3, %v434_v18  ;;  %v443_v58 = vpop.permute.xlu2 %442 }
 0x166   :  { %vm549_vm2 = vcmp.eq.s32.totalorder %v2069_v3, %v443_v58  ;;  %v584_v29 = vsel %vm546_vm1, %v1808_v42, 0.0 }
 0x167   :  { %622 = vadd.xlane.f32.xlu2 %v584_v29  ;;  %v587_v23 = vsel %vm549_vm2, %v1816_v48, 0.0 }
 0x168   :  { %628 = vadd.xlane.f32.xlu1 %v587_v23 }
 0x16c   :  { %v446_v7 = vpop.permute.xlu1 %445 }
 0x16d   :  { %v449_v35 = vpop.permute.xlu2 %448  ;;  %vm550_vm5 = vcmp.eq.s32.totalorder %v2069_v3, %v446_v7 }
 0x16e   :  { %v588_v48 = vsel %vm550_vm5, %v1825_v56, 0.0  ;;  %vm551_vm7 = vcmp.eq.s32.totalorder %v2069_v3, %v449_v35 }
 0x171   :  { %v440_v17 = vpop.permute.xlu0 %439 }
 0x172   :  { %vm548_vm3 = vcmp.eq.s32.totalorder %v2069_v3, %v440_v17  ;;  %v589_v17 = vsel %vm551_vm7, %v1813_v47, 0.0 }
 0x173   :  { %v586_v50 = vsel %vm548_vm3, %v1805_v40, 0.0 }
 0x174   :  { %626 = vadd.xlane.f32.xlu0 %v586_v50  ;;  %v452_v33 = vpop.permute.xlu1 %451 }
 0x175   :  { %v455_v18 = vpop.permute.xlu2 %454  ;;  %vm552_vm10 = vcmp.eq.s32.totalorder %v2069_v3, %v452_v33  ;;  %v67_v33 = vld [vmem:[%s2438_s1 + $0x88] sm:$0xff] }
 0x176   :  { %vm553_vm4 = vcmp.eq.s32.totalorder %v2069_v3, %v455_v18  ;;  %v590_v35 = vsel %vm552_vm10, %v1831_v61, 0.0  ;;  %v63_v61 = vld [vmem:[%s2438_s1 + $0x68] sm:$0xff]  ;;  %v70_v18 = vld [vmem:[%s2438_s1 + $0xa0] sm:$0xff] }
 0x177   :  { %v591_v42 = vsel %vm553_vm4, %v1837_v0, 0.0 }
 0x178   :  { %636 = vadd.xlane.f32.xlu2 %v591_v42  ;;  %v75_v42 = vld [vmem:[%s2438_s1 + $0xc8] sm:$0xff] }
 0x179   :  { %v461_v58 = vpop.permute.xlu0 %460 }
 0x17a   :  { %vm555_vm12 = vcmp.eq.s32.totalorder %v2069_v3, %v461_v58  ;;  %v77_v58 = vld [vmem:[%s2438_s1 + $0xd8] sm:$0xff] }
 0x17c   :  { %630 = vadd.xlane.f32.xlu0 %v588_v48  ;;  %v458_v23 = vpop.permute.xlu1 %457  ;;  %v74_v48 = vld [vmem:[%s2438_s1 + $0xc0] sm:$0xff] }
 0x17d   :  { %vm554_vm6 = vcmp.eq.s32.totalorder %v2069_v3, %v458_v23  ;;  %v464_v40 = vpop.permute.xlu2 %463  ;;  %v76_v23 = vld [vmem:[%s2438_s1 + $0xd0] sm:$0xff] }
 0x17e   :  { %v592_v29 = vsel %vm554_vm6, %v1828_v59, 0.0  ;;  %vm556_vm8 = vcmp.eq.s32.totalorder %v2069_v3, %v464_v40  ;;  %v81_v40 = vld [vmem:[%s2438_s1 + $0xf8] sm:$0xff] }
 0x17f   :  { %638 = vadd.xlane.f32.xlu1 %v592_v29  ;;  %v594_v7 = vsel %vm556_vm8, %v1849_v46, 0.0  ;;  %v80_v29 = vld [vmem:[%s2438_s1 + $0xf0] sm:$0xff] }
 0x181   :  { %v470_v59 = vpop.permute.xlu0 %469 }
 0x182   :  { %vm558_vm11 = vcmp.eq.s32.totalorder %v2069_v3, %v470_v59  ;;  %v85_v59 = vld [vmem:[%s2438_s1 + $0x118] sm:$0xff] }
 0x183   :  { %v596_v47 = vsel %vm558_vm11, %v1856_v55, 0.0  ;;  %v66_v55 = vld [vmem:[%s2438_s1 + $0x80] sm:$0xff] }
 0x184   :  { %632 = vadd.xlane.f32.xlu0 %v589_v17  ;;  %v467_v0 = vpop.permute.xlu1 %466  ;;  %v1382_v17 = vpop.eup %1381 }
 0x185   :  { %vm557_vm9 = vcmp.eq.s32.totalorder %v2069_v3, %v467_v0  ;;  %v357_v0 = vmul.f32 0.6931472, %v1382_v17 }
 0x186   :  { %v595_v56 = vsel %vm557_vm9, %v1841_v38, 0.0  ;;  %v593_v38 = vsel %vm555_vm12, %v1844_v41, 0.0  ;;  %v69_v41 = vld [vmem:[%s2438_s1 + $0x98] sm:$0xff] }
 0x187   :  { %644 = vadd.xlane.f32.xlu2 %v595_v56  ;;  %642 = vadd.xlane.f32.xlu1 %v594_v7 }
 0x18c   :  { %634 = vadd.xlane.f32.xlu0 %v590_v35  ;;  %v476_v50 = vpop.permute.xlu1 %475  ;;  %v1384_v35 = vpop.eup %1383 }
 0x18d   :  { %vm560_vm13 = vcmp.eq.s32.totalorder %v2069_v3, %v476_v50  ;;  %v1386_v50 = vpop.eup %1385  ;;  %v355_v36 = vmul.f32 0.6931472, %v1384_v35 }
 0x18e   :  { %v598_v46 = vsel %vm560_vm13, %v1853_v52, 0.0  ;;  %v73_v52 = vld [vmem:[%s2438_s1 + $0xb8] sm:$0xff] }
 0x18f   :  { %646 = vadd.xlane.f32.xlu1 %v596_v47 }
 0x194   :  { %640 = vadd.xlane.f32.xlu0 %v593_v38 }
 0x197   :  { %650 = vadd.xlane.f32.xlu1 %v598_v46  ;;  %v361_v46 = vmul.f32 0.6931472, %v1386_v50 }
 0x19f   :  { %472 = vperm.xlu2 %1303, %v63_v61  }
 0x1a7   :  { %481 = vperm.xlu2 %1303, %v66_v55  }
 0x1af   :  { %490 = vperm.xlu2 %1303, %v69_v41  }
 0x1b0   :  { %484 = vperm.xlu1 %1302, %v67_v33  }
 0x1b7   :  { %502 = vperm.xlu2 %1303, %v73_v52  }
 0x1b8   :  { %493 = vperm.xlu1 %1302, %v70_v18   ;;  %v87_v18 = vld [vmem:[%s2438_s1 + $0x128] sm:$0xff] }
 0x1bf   :  { %508 = vperm.xlu2 %1303, %v75_v42  }
 0x1c0   :  { %505 = vperm.xlu1 %1302, %v74_v48  }
 0x1c7   :  { %511 = vperm.xlu2 %1303, %v76_v23  }
 0x1c8   :  { %514 = vperm.xlu1 %1302, %v77_v58   ;;  %v1388_v58 = vpop.eup %1387 }
 0x1cf   :  { %523 = vperm.xlu2 %1303, %v80_v29  }
 0x1d0   :  { %526 = vperm.xlu1 %1302, %v81_v40  }
 0x1d3   :  { %v625_v56 = vpop.xlane.xlu1 %624 }
 0x1d4   :  { %v699_v7 = vsub.f32 %v357_v0, %v625_v56  ;;  %v359_v0 = vmul.f32 0.6931472, %v1388_v58 }
 0x1d6   :  { %v737_v47 = vmax.f32 %v699_v7, 0.0 }
 0x1d7   :  { %535 = vperm.xlu2 %1303, %v84_v15  }
 0x1d8   :  { %v775_v38 = vsub.f32 0.0, %v737_v47  ;;  %538 = vperm.xlu1 %1302, %v85_v59  }
 0x1da   :  { %v814_v6 = vmul.f32 1.442695, %v775_v38  ;;  %v623_v61 = vpop.xlane.xlu2 %622 }
 0x1db   :  { %v629_v55 = vpop.xlane.xlu1 %628  ;;  %v698_v41 = vsub.f32 %v355_v36, %v623_v61 }
 0x1dc   :  { %1389 = vpow2.f32 %v814_v6  ;;  %v701_v33 = vsub.f32 %v361_v46, %v629_v55 }
 0x1dd   :  { %v736_v52 = vmax.f32 %v698_v41, 0.0  ;;  %1391 = vlog2.f32 %v2006_v27 }
 0x1de   :  { %v2154_v42 = vmax.f32 %v701_v33, 0.0 }
 0x1df   :  { %v774_v48 = vsub.f32 0.0, %v736_v52 }
 0x1e0   :  { %v777_v23 = vsub.f32 0.0, %v2154_v42  ;;  %544 = vperm.xlu1 %1302, %v87_v18  }
 0x1e1   :  { %v812_v29 = vmul.f32 1.442695, %v774_v48 }
 0x1e2   :  { %v1390_v28 = vpop.eup %1389  ;;  %v818_v17 = vmul.f32 1.442695, %v777_v23 }
 0x1e3   :  { %v889_v40 = vsub.f32 1.0, %v1390_v28  ;;  %1393 = vpow2.f32 %v812_v29  ;;  %v1392_v15 = vpop.eup %1391 }
 0x1e4   :  { %1395 = vlog2.f32 %v1991_v16  ;;  %v369_v36 = vmul.f32 0.6931472, %v1392_v15 }
 0x1e5   :  { %v927_v56 = vmax.f32 %v889_v40, 0.0  ;;  %1397 = vpow2.f32 %v818_v17 }
 0x1e6   :  { %1399 = vlog2.f32 %v1987_v45 }
 0x1e7   :  { %v627_v7 = vpop.xlane.xlu0 %626  ;;  %v965_v27 = vmul.f32 %v927_v56, %v927_v56  ;;  %1401 = vlog2.f32 %v1972_v32 }
 0x1e8   :  { %v700_v59 = vsub.f32 %v359_v0, %v627_v7 }
 0x1e9   :  { %v1394_v35 = vpop.eup %1393  ;;  %v1003_v23 = vmul.f32 %v965_v27, %v737_v47 }
 0x1ea   :  { %v738_v50 = vmax.f32 %v700_v59, 0.0  ;;  %v1396_v38 = vpop.eup %1395  ;;  %v888_v46 = vsub.f32 1.0, %v1394_v35 }
 0x1eb   :  { %v637_v61 = vpop.xlane.xlu2 %636  ;;  %v1398_v41 = vpop.eup %1397  ;;  %v363_v33 = vmul.f32 0.6931472, %v1396_v38  ;;  %v1197_v56 = vsel %vm1195_vm14, %v1003_v23, 0.0 }
 0x1ec   :  { %v776_v6 = vsub.f32 0.0, %v738_v50  ;;  %v926_v55 = vmax.f32 %v888_v46, 0.0  ;;  %v705_v16 = vsub.f32 %v369_v36, %v637_v61  ;;  %v1400_v48 = vpop.eup %1399  ;;  %v891_v28 = vsub.f32 1.0, %v1398_v41 }
 0x1ed   :  { %v371_v17 = vmul.f32 0.6931472, %v1400_v48  ;;  %v1402_v0 = vpop.eup %1401 }
 0x1ee   :  { %v816_v18 = vmul.f32 1.442695, %v776_v6  ;;  %v964_v58 = vmul.f32 %v926_v55, %v926_v55  ;;  %v2169_v38 = vmax.f32 %v705_v16, 0.0  ;;  %v365_v36 = vmul.f32 0.6931472, %v1402_v0 }
 0x1ef   :  { %v631_v29 = vpop.xlane.xlu0 %630 }
 0x1f0   :  { %1403 = vpow2.f32 %v816_v18  ;;  %v702_v45 = vsub.f32 %v363_v33, %v631_v29  ;;  %v1002_v40 = vmul.f32 %v964_v58, %v736_v52 }
 0x1f1   :  { %1405 = vlog2.f32 %v2016_v63  ;;  %v929_v63 = vmax.f32 %v891_v28, 0.0 }
 0x1f2   :  { %1407 = vlog2.f32 %v2002_v54  ;;  %v2163_v32 = vmax.f32 %v702_v45, 0.0  ;;  %v1196_v7 = vsel %vm1195_vm14, %v1002_v40, 0.0  ;;  %v639_v47 = vpop.xlane.xlu1 %638 }
 0x1f3   :  { %v1198_v15 = vadd.f32 %v1197_v56, %v1196_v7  ;;  %v706_v35 = vsub.f32 %v371_v17, %v639_v47  ;;  %1409 = vlog2.f32 %v1989_v26  ;;  %v967_v33 = vmul.f32 %v929_v63, %v929_v63 }
 0x1f4   :  { %v778_v59 = vsub.f32 0.0, %v2163_v32  ;;  %v781_v26 = vsub.f32 0.0, %v2169_v38 }
 0x1f5   :  { %v2171_v6 = vmax.f32 %v706_v35, 0.0 }
 0x1f6   :  { %v1404_v52 = vpop.eup %1403  ;;  %v820_v54 = vmul.f32 1.442695, %v778_v59  ;;  %v826_v7 = vmul.f32 1.442695, %v781_v26 }
 0x1f7   :  { %v1406_v27 = vpop.eup %1405  ;;  %v890_v46 = vsub.f32 1.0, %v1404_v52  ;;  %v633_v61 = vpop.xlane.xlu0 %632  ;;  %v782_v45 = vsub.f32 0.0, %v2171_v6 }
 0x1f8   :  { %v1408_v55 = vpop.eup %1407  ;;  %1411 = vpow2.f32 %v820_v54  ;;  %v703_v41 = vsub.f32 %v365_v36, %v633_v61  ;;  %v375_v48 = vmul.f32 0.6931472, %v1406_v27 }
 0x1f9   :  { %1413 = vlog2.f32 %v2014_v19  ;;  %v928_v18 = vmax.f32 %v890_v46, 0.0  ;;  %v1410_v23 = vpop.eup %1409  ;;  %v377_v58 = vmul.f32 0.6931472, %v1408_v55  ;;  %v1005_v19 = vmul.f32 %v967_v33, %v2154_v42 }
 0x1fa   :  { %v2175_v16 = vmax.f32 %v703_v41, 0.0  ;;  %v643_v28 = vpop.xlane.xlu1 %642  ;;  %v645_v40 = vpop.xlane.xlu2 %644  ;;  %1415 = vlog2.f32 %v2004_v20  ;;  %v367_v35 = vmul.f32 0.6931472, %v1410_v23  ;;  %v828_v46 = vmul.f32 1.442695, %v782_v45 }
 0x1fb   :  { %v966_v29 = vmul.f32 %v928_v18, %v928_v18  ;;  %v708_v0 = vsub.f32 %v375_v48, %v643_v28  ;;  %v709_v47 = vsub.f32 %v377_v58, %v645_v40 }
 0x1fc   :  { %v779_v17 = vsub.f32 0.0, %v2175_v16 }
 0x1fd   :  { %v1004_v56 = vmul.f32 %v966_v29, %v738_v50  ;;  %v2181_v52 = vmax.f32 %v708_v0, 0.0  ;;  %v2184_v61 = vmax.f32 %v709_v47, 0.0  ;;  %v1201_v50 = vsel %vm1195_vm14, %v1005_v19, 0.0 }
 0x1fe   :  { %v1412_v59 = vpop.eup %1411  ;;  %v822_v63 = vmul.f32 1.442695, %v779_v17 }
 0x1ff   :  { %v1414_v36 = vpop.eup %1413  ;;  %v1199_v54 = vsel %vm1195_vm14, %v1004_v56, 0.0  ;;  %v892_v27 = vsub.f32 1.0, %v1412_v59  ;;  %v635_v20 = vpop.xlane.xlu0 %634  ;;  %v784_v42 = vsub.f32 0.0, %v2181_v52  ;;  %v785_v23 = vsub.f32 0.0, %v2184_v61 }
 0x200   :  { %v1200_v55 = vadd.f32 %v1199_v54, %v1198_v15  ;;  %1417 = vpow2.f32 %v822_v63  ;;  %v704_v33 = vsub.f32 %v367_v35, %v635_v20  ;;  %v1416_v18 = vpop.eup %1415  ;;  %v379_v26 = vmul.f32 0.6931472, %v1414_v36 }
 0x201   :  { %1419 = vpow2.f32 %v826_v7  ;;  %v930_v41 = vmax.f32 %v892_v27, 0.0  ;;  %v832_v28 = vmul.f32 1.442695, %v784_v42  ;;  %v373_v56 = vmul.f32 0.6931472, %v1416_v18 }
 0x202   :  { %1421 = vlog2.f32 %v2018_v37  ;;  %v1202_v48 = vadd.f32 %v1201_v50, %v1200_v55  ;;  %v742_v29 = vmax.f32 %v704_v33, 0.0  ;;  %v473_v45 = vpop.permute.xlu2 %472  ;;  %v647_v15 = vpop.xlane.xlu1 %646  ;;  %v834_v7 = vmul.f32 1.442695, %v785_v23 }
 0x203   :  { %v968_v58 = vmul.f32 %v930_v41, %v930_v41  ;;  %1423 = vpow2.f32 %v828_v46  ;;  %vm559_vm15 = vcmp.eq.s32.totalorder %v2069_v3, %v473_v45  ;;  %v710_v40 = vsub.f32 %v379_v26, %v647_v15 }
 0x204   :  { %v780_v0 = vsub.f32 0.0, %v742_v29  ;;  %v597_v47 = vsel %vm559_vm15, %v1861_v62, 0.0  ;;  %1425 = vpow2.f32 %v832_v28 }
 0x205   :  { %v1006_v17 = vmul.f32 %v968_v58, %v2163_v32  ;;  %v2192_v37 = vmax.f32 %v710_v40, 0.0  ;;  %648 = vadd.xlane.f32.xlu0 %v597_v47 }
 0x206   :  { %v1418_v19 = vpop.eup %1417  ;;  %v824_v36 = vmul.f32 1.442695, %v780_v0 }
 0x207   :  { %v1420_v59 = vpop.eup %1419  ;;  %v1203_v35 = vsel %vm1195_vm14, %v1006_v17, 0.0  ;;  %v893_v63 = vsub.f32 1.0, %v1418_v19  ;;  %v641_v54 = vpop.xlane.xlu0 %640  ;;  %v786_v32 = vsub.f32 0.0, %v2192_v37 }
 0x208   :  { %v1422_v27 = vpop.eup %1421  ;;  %v1204_v46 = vadd.f32 %v1203_v35, %v1202_v48  ;;  %v707_v20 = vsub.f32 %v373_v56, %v641_v54  ;;  %1427 = vpow2.f32 %v824_v36  ;;  %v895_v50 = vsub.f32 1.0, %v1420_v59 }
 0x209   :  { %v1424_v55 = vpop.eup %1423  ;;  %v931_v42 = vmax.f32 %v893_v63, 0.0  ;;  %1429 = vpow2.f32 %v834_v7  ;;  %v836_v41 = vmul.f32 1.442695, %v786_v32  ;;  %v2197_v33 = vmul.f32 0.6931472, %v1422_v27 }
 0x20a   :  { %v745_v62 = vmax.f32 %v707_v20, 0.0  ;;  %v2199_v26 = vpop.permute.xlu2 %481  ;;  %v2201_v23 = vpop.xlane.xlu1 %650  ;;  %v896_v58 = vsub.f32 1.0, %v1424_v55  ;;  %v933_v40 = vmax.f32 %v895_v50, 0.0 }
 0x20b   :  { %v969_v18 = vmul.f32 %v931_v42, %v931_v42  ;;  %1431 = vpow2.f32 %v836_v41  ;;  %v712_v15 = vsub.f32 %v2197_v33, %v2201_v23  ;;  %v1426_v28 = vpop.eup %1425  ;;  %vm562_vm3 = vcmp.eq.s32.totalorder %v2069_v3, %v2199_v26 }
 0x20c   :  { %v783_v48 = vsub.f32 0.0, %v745_v62  ;;  %v934_v7 = vmax.f32 %v896_v58, 0.0  ;;  %v898_v35 = vsub.f32 1.0, %v1426_v28  ;;  %v971_v36 = vmul.f32 %v933_v40, %v933_v40  ;;  %v65_v28 = vld [vmem:[%s2438_s1 + $0x78] sm:$0xff] }
 0x20d   :  { %v1007_v45 = vmul.f32 %v969_v18, %v2175_v16  ;;  %v600_v33 = vsel %vm562_vm3, %v1873_v39, 0.0 }
 0x20e   :  { %v830_v17 = vmul.f32 1.442695, %v783_v48  ;;  %v1428_v0 = vpop.eup %1427  ;;  %v972_v32 = vmul.f32 %v934_v7, %v934_v7  ;;  %v936_v55 = vmax.f32 %v898_v35, 0.0  ;;  %v1009_v41 = vmul.f32 %v971_v36, %v2169_v38 }
 0x20f   :  { %v1205_v19 = vsel %vm1195_vm14, %v1007_v45, 0.0  ;;  %v1430_v56 = vpop.eup %1429  ;;  %v894_v59 = vsub.f32 1.0, %v1428_v0 }
 0x210   :  { %v1206_v47 = vadd.f32 %v1205_v19, %v1204_v46  ;;  %1433 = vpow2.f32 %v830_v17  ;;  %v899_v27 = vsub.f32 1.0, %v1430_v56  ;;  %v1010_v46 = vmul.f32 %v972_v32, %v2171_v6 }
 0x211   :  { %v1432_v63 = vpop.eup %1431  ;;  %v932_v54 = vmax.f32 %v894_v59, 0.0  ;;  %v974_v40 = vmul.f32 %v936_v55, %v936_v55  ;;  %v1209_v56 = vsel %vm1195_vm14, %v1009_v41, 0.0  ;;  %1435 = vlog2.f32 %v2028_v30 }
 0x212   :  { %v2207_v16 = vpop.permute.xlu2 %490  ;;  %v900_v42 = vsub.f32 1.0, %v1432_v63  ;;  %v937_v48 = vmax.f32 %v899_v27, 0.0  ;;  %v1211_v35 = vsel %vm1195_vm14, %v1010_v46, 0.0 }
 0x213   :  { %v970_v20 = vmul.f32 %v932_v54, %v932_v54  ;;  %v1012_v6 = vmul.f32 %v974_v40, %v2181_v52  ;;  %v78_v40 = vld [vmem:[%s2438_s1 + $0xe0] sm:$0xff]  ;;  %vm565_vm6 = vcmp.eq.s32.totalorder %v2069_v3, %v2207_v16 }
 0x214   :  { %v938_v0 = vmax.f32 %v900_v42, 0.0  ;;  %v975_v7 = vmul.f32 %v937_v48, %v937_v48 }
 0x215   :  { %v1008_v18 = vmul.f32 %v970_v20, %v742_v29  ;;  %v68_v20 = vld [vmem:[%s2438_s1 + $0x90] sm:$0xff]  ;;  %v1215_v55 = vsel %vm1195_vm14, %v1012_v6, 0.0 }
 0x216   :  { %v1434_v50 = vpop.eup %1433  ;;  %v976_v63 = vmul.f32 %v938_v0, %v938_v0  ;;  %v1013_v27 = vmul.f32 %v975_v7, %v2184_v61  ;;  %v86_v0 = vld [vmem:[%s2438_s1 + $0x120] sm:$0xff] }
 0x217   :  { %v897_v58 = vsub.f32 1.0, %v1434_v50  ;;  %v1207_v45 = vsel %vm1195_vm14, %v1008_v18, 0.0  ;;  %v1436_v7 = vpop.eup %1435 }
 0x218   :  { %v1208_v17 = vadd.f32 %v1207_v45, %v1206_v47  ;;  %v1014_v42 = vmul.f32 %v976_v63, %v2192_v37  ;;  %v1217_v41 = vsel %vm1195_vm14, %v1013_v27, 0.0  ;;  %v71_v37 = vld [vmem:[%s2438_s1 + $0xa8] sm:$0xff] }
 0x219   :  { %v935_v19 = vmax.f32 %v897_v58, 0.0  ;;  %478 = vperm.xlu0 %1304, %v65_v28   ;;  %v72_v28 = vld [vmem:[%s2438_s1 + $0xb0] sm:$0xff] }
 0x21a   :  { %v1210_v59 = vadd.f32 %v1209_v56, %v1208_v17  ;;  %v503_v29 = vpop.permute.xlu2 %502  ;;  %v1219_v61 = vsel %vm1195_vm14, %v1014_v42, 0.0  ;;  %v82_v17 = vld [vmem:[%s2438_s1 + $0x100] sm:$0xff] }
 0x21b   :  { %v973_v38 = vmul.f32 %v935_v19, %v935_v19  ;;  %vm569_vm1 = vcmp.eq.s32.totalorder %v2069_v3, %v503_v29  ;;  %v750_v19 = vmax.f32 %v712_v15, 0.0 }
 0x21c   :  { %v1212_v36 = vadd.f32 %v1211_v35, %v1210_v59  ;;  %v607_v46 = vsel %vm569_vm1, %v1889_v10, 0.0  ;;  %v79_v10 = vld [vmem:[%s2438_s1 + $0xe8] sm:$0xff] }
 0x21d   :  { %v1011_v54 = vmul.f32 %v973_v38, %v745_v62  ;;  %v788_v56 = vsub.f32 0.0, %v750_v19  ;;  %v381_v38 = vmul.f32 0.6931472, %v1436_v7 }
 0x21f   :  { %v1213_v47 = vsel %vm1195_vm14, %v1011_v54, 0.0  ;;  %v840_v59 = vmul.f32 1.442695, %v788_v56 }
 0x220   :  { %v1214_v32 = vadd.f32 %v1213_v47, %v1212_v36 }
 0x221   :  { %487 = vperm.xlu0 %1304, %v68_v20   ;;  %1437 = vpow2.f32 %v840_v59 }
 0x222   :  { %v1216_v50 = vadd.f32 %v1215_v55, %v1214_v32  ;;  %v485_v52 = vpop.permute.xlu1 %484  ;;  %v2228_v18 = vpop.permute.xlu2 %508 }
 0x223   :  { %vm563_vm0 = vcmp.eq.s32.totalorder %v2069_v3, %v485_v52  ;;  %vm571_vm9 = vcmp.eq.s32.totalorder %v2069_v3, %v2228_v18 }
 0x224   :  { %v1218_v62 = vadd.f32 %v1217_v41, %v1216_v50  ;;  %v601_v48 = vsel %vm563_vm0, %v1865_v1, 0.0 }
 0x225   :  { %656 = vadd.xlane.f32.xlu1 %v601_v48 }
 0x226   :  { %v1220_v58 = vadd.f32 %v1219_v61, %v1218_v62 }
 0x227   :  { %v1438_v36 = vpop.eup %1437 }
 0x228   :  { %v902_v27 = vsub.f32 1.0, %v1438_v36 }
 0x229   :  { %496 = vperm.xlu0 %1304, %v71_v37  }
 0x22a   :  { %v512_v45 = vpop.permute.xlu2 %511  ;;  %v940_v30 = vmax.f32 %v902_v27, 0.0  ;;  %v494_v48 = vpop.permute.xlu1 %493 }
 0x22b   :  { %vm572_vm2 = vcmp.eq.s32.totalorder %v2069_v3, %v512_v45  ;;  %vm566_vm7 = vcmp.eq.s32.totalorder %v2069_v3, %v494_v48 }
 0x22c   :  { %v610_v1 = vsel %vm572_vm2, %v1901_v5, 0.0  ;;  %v83_v5 = vld [vmem:[%s2438_s1 + $0x108] sm:$0xff]  ;;  %v978_v47 = vmul.f32 %v940_v30, %v940_v30 }
 0x22d   :  { %668 = vadd.xlane.f32.xlu1 %v607_v46  ;;  %v603_v46 = vsel %vm565_vm6, %v1885_v53, 0.0 }
 0x22e   :  { %v1016_v50 = vmul.f32 %v978_v47, %v750_v19  ;;  %v2465_v47 = vld [vmem:[#allocation7_spill] sm:$0xff] }
 0x230   :  { %v1223_v39 = vsel %vm1195_vm14, %v1016_v50, 0.0  ;;  %v2466_v50 = vld [vmem:[#allocation12_spill] sm:$0xff] }
 0x231   :  { %499 = vperm.xlu0 %1304, %v72_v28   ;;  %v604_v28 = vsel %vm566_vm7, %v1877_v43, 0.0 }
 0x232   :  { %v506_v45 = vpop.permute.xlu1 %505 }
 0x233   :  { %vm570_vm11 = vcmp.eq.s32.totalorder %v2069_v3, %v506_v45 }
 0x234   :  { %v608_v18 = vsel %vm570_vm11, %v1904_v8, 0.0 }
 0x235   :  { %674 = vadd.xlane.f32.xlu1 %v610_v1 }
 0x239   :  { %517 = vperm.xlu0 %1304, %v78_v40   ;;  %v609_v40 = vsel %vm571_vm9, %v1909_v44, 0.0 }
 0x241   :  { %520 = vperm.xlu0 %1304, %v79_v10   ;;  %v524_v10 = vpop.permute.xlu2 %523 }
 0x242   :  { %vm576_vm2 = vcmp.eq.s32.totalorder %v2069_v3, %v524_v10 }
 0x243   :  { %v614_v7 = vsel %vm576_vm2, %v1928_v14, 0.0 }
 0x249   :  { %529 = vperm.xlu0 %1304, %v82_v17  }
 0x251   :  { %532 = vperm.xlu0 %1304, %v83_v5  }
 0x259   :  { %541 = vperm.xlu0 %1304, %v86_v0  }
 0x278   :  { %v649_v29 = vpop.xlane.xlu0 %648 }
 0x279   :  { %v711_v35 = vsub.f32 %v381_v38, %v649_v29  ;;  %v2463_v38 = vld [vmem:[#allocation8_spill] sm:$0xff] }
 0x27b   :  { %v749_v6 = vmax.f32 %v711_v35, 0.0 }
 0x27d   :  { %v787_v63 = vsub.f32 0.0, %v749_v6 }
 0x27f   :  { %v838_v54 = vmul.f32 1.442695, %v787_v63 }
 0x281   :  { %1439 = vpow2.f32 %v838_v54 }
 0x283   :  { %654 = vadd.xlane.f32.xlu0 %v600_v33 }
 0x287   :  { %v1440_v23 = vpop.eup %1439 }
 0x288   :  { %v901_v15 = vsub.f32 1.0, %v1440_v23 }
 0x28a   :  { %v939_v32 = vmax.f32 %v901_v15, 0.0 }
 0x28b   :  { %v479_v20 = vpop.permute.xlu0 %478 }
 0x28c   :  { %v977_v55 = vmul.f32 %v939_v32, %v939_v32  ;;  %vm561_vm4 = vcmp.eq.s32.totalorder %v2069_v3, %v479_v20 }
 0x28d   :  { %v599_v42 = vsel %vm561_vm4, %v1868_v4, 0.0 }
 0x28e   :  { %v1015_v41 = vmul.f32 %v977_v55, %v749_v6  ;;  %652 = vadd.xlane.f32.xlu2 %v599_v42 }
 0x290   :  { %v1221_v26 = vsel %vm1195_vm14, %v1015_v41, 0.0 }
 0x291   :  { %v1222_v52 = vadd.f32 %v1221_v26, %v1220_v58 }
 0x293   :  { %v488_v62 = vpop.permute.xlu0 %487  ;;  %v2267_v61 = vadd.f32 %v1223_v39, %v1222_v52  ;;  %v2467_v39 = vld [vmem:[#allocation11_spill] sm:$0xff] }
 0x294   :  { %vm564_vm5 = vcmp.eq.s32.totalorder %v2069_v3, %v488_v62 }
 0x295   :  { %v602_v37 = vsel %vm564_vm5, %v1880_v49, 0.0  ;;  %v515_v49 = vpop.permute.xlu1 %514 }
 0x296   :  { %658 = vadd.xlane.f32.xlu2 %v602_v37  ;;  %vm573_vm15 = vcmp.eq.s32.totalorder %v2069_v3, %v515_v49 }
 0x297   :  { %v611_v0 = vsel %vm573_vm15, %v1916_v51, 0.0 }
 0x29b   :  { %v497_v4 = vpop.permute.xlu0 %496 }
 0x29c   :  { %vm567_vm10 = vcmp.eq.s32.totalorder %v2069_v3, %v497_v4 }
 0x29d   :  { %v605_v16 = vsel %vm567_vm10, %v1892_v60, 0.0  ;;  %v527_v43 = vpop.permute.xlu1 %526 }
 0x29e   :  { %660 = vadd.xlane.f32.xlu2 %v603_v46  ;;  %vm577_vm0 = vcmp.eq.s32.totalorder %v2069_v3, %v527_v43 }
 0x29f   :  { %v615_v19 = vsel %vm577_vm0, %v1933_v13, 0.0 }
 0x2a3   :  { %v500_v58 = vpop.permute.xlu0 %499 }
 0x2a4   :  { %vm568_vm8 = vcmp.eq.s32.totalorder %v2069_v3, %v500_v58 }
 0x2a5   :  { %v606_v1 = vsel %vm568_vm8, %v1897_v2, 0.0  ;;  %v539_v44 = vpop.permute.xlu1 %538 }
 0x2a6   :  { %662 = vadd.xlane.f32.xlu2 %v604_v28  ;;  %666 = vadd.xlane.f32.xlu0 %v606_v1  ;;  %vm581_vm4 = vcmp.eq.s32.totalorder %v2069_v3, %v539_v44 }
 0x2a7   :  { %v619_v51 = vsel %vm581_vm4, %v1937_v22, 0.0  ;;  %v2462_v22 = vld [vmem:[#allocation6_spill] sm:$0xff] }
 0x2a8   :  { %1441 = vlog2.f32 %v2462_v22 }
 0x2a9   :  { %1443 = vlog2.f32 %v2463_v38  ;;  %v2471_v38 = vld [vmem:[#allocation10_spill] sm:$0xff] }
 0x2ab   :  { %v518_v53 = vpop.permute.xlu0 %517 }
 0x2ac   :  { %vm574_vm12 = vcmp.eq.s32.totalorder %v2069_v3, %v518_v53 }
 0x2ad   :  { %v612_v17 = vsel %vm574_vm12, %v1921_v57, 0.0 }
 0x2ae   :  { %664 = vadd.xlane.f32.xlu2 %v605_v16  ;;  %672 = vadd.xlane.f32.xlu0 %v609_v40  ;;  %v1442_v29 = vpop.eup %1441  ;;  %v2468_v40 = vld [vmem:[#allocation16_spill] sm:$0xff] }
 0x2af   :  { %v1444_v6 = vpop.eup %1443  ;;  %v389_v63 = vmul.f32 0.6931472, %v1442_v29 }
 0x2b3   :  { %v521_v2 = vpop.permute.xlu0 %520 }
 0x2b4   :  { %vm575_vm13 = vcmp.eq.s32.totalorder %v2069_v3, %v521_v2  ;;  %v2469_v2 = vld [vmem:[#allocation9_spill] sm:$0xff] }
 0x2b5   :  { %v613_v5 = vsel %vm575_vm13, %v1913_v9, 0.0  ;;  %v536_v9 = vpop.permute.xlu2 %535 }
 0x2b6   :  { %670 = vadd.xlane.f32.xlu2 %v608_v18  ;;  %678 = vadd.xlane.f32.xlu0 %v612_v17  ;;  %vm580_vm3 = vcmp.eq.s32.totalorder %v2069_v3, %v536_v9  ;;  %v2470_v18 = vld [vmem:[#allocation14_spill] sm:$0xff] }
 0x2b7   :  { %680 = vadd.xlane.f32.xlu1 %v613_v5  ;;  %v618_v57 = vsel %vm580_vm3, %v1945_v11, 0.0 }
 0x2bb   :  { %v530_v60 = vpop.permute.xlu0 %529 }
 0x2bc   :  { %vm578_vm1 = vcmp.eq.s32.totalorder %v2069_v3, %v530_v60 }
 0x2bd   :  { %v616_v8 = vsel %vm578_vm1, %v1925_v12, 0.0  ;;  %v545_v12 = vpop.permute.xlu1 %544 }
 0x2be   :  { %676 = vadd.xlane.f32.xlu2 %v611_v0  ;;  %684 = vadd.xlane.f32.xlu0 %v615_v19  ;;  %vm583_vm5 = vcmp.eq.s32.totalorder %v2069_v3, %v545_v12 }
 0x2bf   :  { %686 = vadd.xlane.f32.xlu1 %v616_v8  ;;  %v621_v13 = vsel %vm583_vm5, %v1953_v34, 0.0  ;;  %v387_v34 = vmul.f32 0.6931472, %v1444_v6 }
 0x2c3   :  { %v533_v56 = vpop.permute.xlu0 %532 }
 0x2c4   :  { %vm579_vm6 = vcmp.eq.s32.totalorder %v2069_v3, %v533_v56 }
 0x2c5   :  { %v617_v59 = vsel %vm579_vm6, %v1940_v31, 0.0  ;;  %v657_v35 = vpop.xlane.xlu1 %656  ;;  %v2464_v31 = vld [vmem:[#allocation5_spill] sm:$0xff] }
 0x2c6   :  { %682 = vadd.xlane.f32.xlu2 %v614_v7  ;;  %690 = vadd.xlane.f32.xlu0 %v618_v57  ;;  %v715_v36 = vsub.f32 %v389_v63, %v657_v35  ;;  %1445 = vlog2.f32 %v2464_v31  ;;  %v2472_v63 = vld [vmem:[#allocation17_spill] sm:$0xff] }
 0x2c7   :  { %692 = vadd.xlane.f32.xlu1 %v619_v51  ;;  %1447 = vlog2.f32 %v2465_v47 }
 0x2c8   :  { %v2310_v33 = vmax.f32 %v715_v36, 0.0 }
 0x2cb   :  { %v542_v11 = vpop.permute.xlu0 %541 }
 0x2cc   :  { %vm582_vm7 = vcmp.eq.s32.totalorder %v2069_v3, %v542_v11  ;;  %v1446_v23 = vpop.eup %1445 }
 0x2cd   :  { %v620_v14 = vsel %vm582_vm7, %v1949_v25, 0.0  ;;  %v791_v25 = vsub.f32 0.0, %v2310_v33  ;;  %v385_v32 = vmul.f32 0.6931472, %v1446_v23  ;;  %v1448_v26 = vpop.eup %1447  ;;  %v669_v1 = vpop.xlane.xlu1 %668 }
 0x2ce   :  { %696 = vadd.xlane.f32.xlu0 %v621_v13  ;;  %688 = vadd.xlane.f32.xlu2 %v617_v59  ;;  %v391_v48 = vmul.f32 0.6931472, %v1448_v26 }
 0x2cf   :  { %v846_v20 = vmul.f32 1.442695, %v791_v25 }
 0x2d5   :  { %v675_v35 = vpop.xlane.xlu1 %674 }
 0x2d6   :  { %694 = vadd.xlane.f32.xlu2 %v620_v14 }
 0x2f6   :  { %v655_v54 = vpop.xlane.xlu0 %654 }
 0x2f7   :  { %v714_v27 = vsub.f32 %v387_v34, %v655_v54 }
 0x2f9   :  { %v752_v3 = vmax.f32 %v714_v27, 0.0 }
 0x2fb   :  { %v790_v30 = vsub.f32 0.0, %v752_v3 }
 0x2fd   :  { %v844_v15 = vmul.f32 1.442695, %v790_v30 }
 0x2ff   :  { %1449 = vpow2.f32 %v844_v15 }
 0x300   :  { %1451 = vlog2.f32 %v2466_v50 }
 0x301   :  { %v653_v55 = vpop.xlane.xlu2 %652  ;;  %1453 = vpow2.f32 %v846_v20 }
 0x302   :  { %v713_v42 = vsub.f32 %v385_v32, %v653_v55  ;;  %1455 = vlog2.f32 %v2467_v39 }
 0x304   :  { %v751_v41 = vmax.f32 %v713_v42, 0.0 }
 0x305   :  { %v1450_v62 = vpop.eup %1449 }
 0x306   :  { %v789_v52 = vsub.f32 0.0, %v751_v41  ;;  %v1452_v4 = vpop.eup %1451  ;;  %v904_v28 = vsub.f32 1.0, %v1450_v62 }
 0x307   :  { %v1454_v45 = vpop.eup %1453  ;;  %v401_v16 = vmul.f32 0.6931472, %v1452_v4  ;;  %v2473_v4 = vld [vmem:[#allocation13_spill] sm:$0xff] }
 0x308   :  { %v842_v37 = vmul.f32 1.442695, %v789_v52  ;;  %v1456_v53 = vpop.eup %1455  ;;  %v905_v43 = vsub.f32 1.0, %v1454_v45  ;;  %v942_v5 = vmax.f32 %v904_v28, 0.0 }
 0x309   :  { %v659_v46 = vpop.xlane.xlu2 %658  ;;  %v721_v17 = vsub.f32 %v401_v16, %v669_v1  ;;  %v393_v44 = vmul.f32 0.6931472, %v1456_v53 }
 0x30a   :  { %1457 = vpow2.f32 %v842_v37  ;;  %v716_v58 = vsub.f32 %v391_v48, %v659_v46  ;;  %v943_v19 = vmax.f32 %v905_v43, 0.0  ;;  %v980_v51 = vmul.f32 %v942_v5, %v942_v5 }
 0x30b   :  { %1459 = vlog2.f32 %v2468_v40  ;;  %v2322_v7 = vmax.f32 %v721_v17, 0.0 }
 0x30c   :  { %v2316_v49 = vmax.f32 %v716_v58, 0.0  ;;  %1461 = vlog2.f32 %v2469_v2  ;;  %v981_v14 = vmul.f32 %v943_v19, %v943_v19  ;;  %v1018_v34 = vmul.f32 %v980_v51, %v752_v3  ;;  %v2474_v2 = vld [vmem:[#allocation19_spill] sm:$0xff] }
 0x30d   :  { %1463 = vlog2.f32 %v2470_v18  ;;  %v797_v36 = vsub.f32 0.0, %v2322_v7 }
 0x30e   :  { %v792_v10 = vsub.f32 0.0, %v2316_v49  ;;  %v1019_v23 = vmul.f32 %v981_v14, %v2310_v33  ;;  %v1227_v3 = vsel %vm1195_vm14, %v1018_v34, 0.0  ;;  %v2478_v34 = vld [vmem:[#allocation22_spill] sm:$0xff] }
 0x30f   :  { %v858_v52 = vmul.f32 1.442695, %v797_v36 }
 0x310   :  { %v1458_v60 = vpop.eup %1457  ;;  %v848_v0 = vmul.f32 1.442695, %v792_v10  ;;  %v1229_v46 = vsel %vm1195_vm14, %v1019_v23, 0.0 }
 0x311   :  { %v903_v8 = vsub.f32 1.0, %v1458_v60  ;;  %v661_v9 = vpop.xlane.xlu2 %660  ;;  %v1460_v56 = vpop.eup %1459 }
 0x312   :  { %1465 = vpow2.f32 %v848_v0  ;;  %v717_v57 = vsub.f32 %v393_v44, %v661_v9  ;;  %v1462_v13 = vpop.eup %1461  ;;  %v407_v29 = vmul.f32 0.6931472, %v1460_v56  ;;  %v2475_v56 = vld [vmem:[#allocation15_spill] sm:$0xff] }
 0x313   :  { %v941_v12 = vmax.f32 %v903_v8, 0.0  ;;  %v1464_v11 = vpop.eup %1463  ;;  %1467 = vlog2.f32 %v2471_v38  ;;  %v395_v27 = vmul.f32 0.6931472, %v1462_v13 }
 0x314   :  { %v2324_v59 = vmax.f32 %v717_v57, 0.0  ;;  %1469 = vlog2.f32 %v2472_v63  ;;  %v399_v30 = vmul.f32 0.6931472, %v1464_v11  ;;  %v724_v15 = vsub.f32 %v407_v29, %v675_v35  ;;  %v2476_v11 = vld [vmem:[#allocation21_spill] sm:$0xff]  ;;  %v2477_v29 = vld [vmem:[#allocation18_spill] sm:$0xff] }
 0x315   :  { %v979_v22 = vmul.f32 %v941_v12, %v941_v12 }
 0x316   :  { %v793_v6 = vsub.f32 0.0, %v2324_v59  ;;  %v2340_v45 = vmax.f32 %v724_v15, 0.0 }
 0x317   :  { %v1017_v54 = vmul.f32 %v979_v22, %v751_v41 }
 0x318   :  { %v1466_v31 = vpop.eup %1465  ;;  %v850_v25 = vmul.f32 1.442695, %v793_v6  ;;  %v800_v17 = vsub.f32 0.0, %v2340_v45 }
 0x319   :  { %v1225_v47 = vsel %vm1195_vm14, %v1017_v54, 0.0  ;;  %v906_v32 = vsub.f32 1.0, %v1466_v31  ;;  %v663_v20 = vpop.xlane.xlu2 %662  ;;  %v667_v55 = vpop.xlane.xlu0 %666 }
 0x31a   :  { %v1226_v42 = vadd.f32 %v1225_v47, %v2267_v61  ;;  %1471 = vpow2.f32 %v850_v25  ;;  %v718_v50 = vsub.f32 %v395_v27, %v663_v20  ;;  %v720_v26 = vsub.f32 %v399_v30, %v667_v55  ;;  %v1468_v39 = vpop.eup %1467 }
 0x31b   :  { %v944_v41 = vmax.f32 %v906_v32, 0.0  ;;  %v1470_v37 = vpop.eup %1469  ;;  %1473 = vlog2.f32 %v2473_v4  ;;  %v397_v53 = vmul.f32 0.6931472, %v1468_v39  ;;  %v864_v14 = vmul.f32 1.442695, %v800_v17 }
 0x31c   :  { %v1228_v62 = vadd.f32 %v1227_v3, %v1226_v42  ;;  %v2334_v48 = vmax.f32 %v718_v50, 0.0  ;;  %v2336_v33 = vmax.f32 %v720_v26, 0.0  ;;  %1475 = vlog2.f32 %v2056_v24 }
 0x31d   :  { %v982_v61 = vmul.f32 %v944_v41, %v944_v41  ;;  %1477 = vpow2.f32 %v858_v52  ;;  %v405_v43 = vmul.f32 0.6931472, %v1470_v37 }
 0x31e   :  { %v1230_v58 = vadd.f32 %v1229_v46, %v1228_v62  ;;  %v794_v28 = vsub.f32 0.0, %v2334_v48  ;;  %v796_v1 = vsub.f32 0.0, %v2336_v33  ;;  %1479 = vlog2.f32 %v2474_v2 }
 0x31f   :  { %v1020_v16 = vmul.f32 %v982_v61, %v2316_v49 }
 0x320   :  { %v1472_v40 = vpop.eup %1471  ;;  %v852_v10 = vmul.f32 1.442695, %v794_v28  ;;  %v856_v18 = vmul.f32 1.442695, %v796_v1 }
 0x321   :  { %v1231_v5 = vsel %vm1195_vm14, %v1020_v16, 0.0  ;;  %v907_v24 = vsub.f32 1.0, %v1472_v40  ;;  %v665_v60 = vpop.xlane.xlu2 %664  ;;  %v673_v44 = vpop.xlane.xlu0 %672  ;;  %v2480_v40 = vld [vmem:[#allocation25_spill] sm:$0xff] }
 0x322   :  { %v1232_v0 = vadd.f32 %v1231_v5, %v1230_v58  ;;  %1481 = vpow2.f32 %v852_v10  ;;  %v719_v19 = vsub.f32 %v397_v53, %v665_v60  ;;  %v723_v8 = vsub.f32 %v405_v43, %v673_v44  ;;  %v1474_v9 = vpop.eup %1473  ;;  %v2479_v58 = vld [vmem:[#allocation24_spill] sm:$0xff] }
 0x323   :  { %v945_v57 = vmax.f32 %v907_v24, 0.0  ;;  %1483 = vpow2.f32 %v856_v18  ;;  %v1476_v49 = vpop.eup %1475  ;;  %v403_v63 = vmul.f32 0.6931472, %v1474_v9 }
 0x324   :  { %1485 = vlog2.f32 %v2475_v56  ;;  %v2350_v51 = vmax.f32 %v719_v19, 0.0  ;;  %v2352_v12 = vmax.f32 %v723_v8, 0.0  ;;  %v1478_v13 = vpop.eup %1477  ;;  %v413_v36 = vmul.f32 0.6931472, %v1476_v49 }
 0x325   :  { %1487 = vlog2.f32 %v2476_v11  ;;  %v983_v22 = vmul.f32 %v945_v57, %v945_v57  ;;  %v1480_v38 = vpop.eup %1479  ;;  %v911_v27 = vsub.f32 1.0, %v1478_v13 }
 0x326   :  { %1489 = vlog2.f32 %v2477_v29  ;;  %v795_v35 = vsub.f32 0.0, %v2350_v51  ;;  %v799_v6 = vsub.f32 0.0, %v2352_v12  ;;  %v411_v15 = vmul.f32 0.6931472, %v1480_v38 }
 0x327   :  { %1491 = vlog2.f32 %v2478_v34  ;;  %v1021_v54 = vmul.f32 %v983_v22, %v2324_v59  ;;  %v949_v4 = vmax.f32 %v911_v27, 0.0 }
 0x328   :  { %v1482_v31 = vpop.eup %1481  ;;  %v854_v30 = vmul.f32 1.442695, %v795_v35  ;;  %v862_v25 = vmul.f32 1.442695, %v799_v6  ;;  %1493 = vpow2.f32 %v864_v14 }
 0x329   :  { %v1484_v23 = vpop.eup %1483  ;;  %v1233_v47 = vsel %vm1195_vm14, %v1021_v54, 0.0  ;;  %v908_v32 = vsub.f32 1.0, %v1482_v31  ;;  %v671_v20 = vpop.xlane.xlu2 %670  ;;  %v987_v19 = vmul.f32 %v949_v4, %v949_v4 }
 0x32a   :  { %v679_v55 = vpop.xlane.xlu0 %678  ;;  %v1486_v42 = vpop.eup %1485  ;;  %v1234_v50 = vadd.f32 %v1233_v47, %v1232_v0  ;;  %v910_v26 = vsub.f32 1.0, %v1484_v23  ;;  %1495 = vpow2.f32 %v854_v30  ;;  %v722_v52 = vsub.f32 %v403_v63, %v671_v20  ;;  %v2481_v30 = vld [vmem:[#allocation20_spill] sm:$0xff] }
 0x32b   :  { %v681_v3 = vpop.xlane.xlu1 %680  ;;  %v1488_v41 = vpop.eup %1487  ;;  %v946_v59 = vmax.f32 %v908_v32, 0.0  ;;  %1497 = vpow2.f32 %v862_v25  ;;  %v726_v62 = vsub.f32 %v411_v15, %v679_v55  ;;  %v409_v16 = vmul.f32 0.6931472, %v1486_v42 }
 0x32c   :  { %v727_v39 = vsub.f32 %v413_v36, %v681_v3  ;;  %v1490_v37 = vpop.eup %1489  ;;  %v2361_v46 = vmax.f32 %v722_v52, 0.0  ;;  %1499 = vlog2.f32 %v2479_v58  ;;  %v948_v43 = vmax.f32 %v910_v26, 0.0 }
 0x32d   :  { %v1492_v61 = vpop.eup %1491  ;;  %v984_v28 = vmul.f32 %v946_v59, %v946_v59  ;;  %v2366_v53 = vmax.f32 %v726_v62, 0.0  ;;  %1501 = vlog2.f32 %v2480_v40  ;;  %v419_v18 = vmul.f32 0.6931472, %v1488_v41 }
 0x32e   :  { %v2364_v1 = vmax.f32 %v727_v39, 0.0  ;;  %v798_v2 = vsub.f32 0.0, %v2361_v46  ;;  %v1494_v10 = vpop.eup %1493  ;;  %v2373_v44 = vmul.f32 0.6931472, %v1490_v37  ;;  %v417_v0 = vmul.f32 0.6931472, %v1492_v61 }
 0x32f   :  { %v1022_v17 = vmul.f32 %v984_v28, %v2334_v48  ;;  %v802_v24 = vsub.f32 0.0, %v2366_v53  ;;  %v986_v48 = vmul.f32 %v948_v43, %v948_v43  ;;  %v1025_v54 = vmul.f32 %v987_v19, %v2322_v7 }
 0x330   :  { %v803_v5 = vsub.f32 0.0, %v2364_v1  ;;  %v1496_v60 = vpop.eup %1495  ;;  %v860_v8 = vmul.f32 1.442695, %v798_v2  ;;  %v914_v31 = vsub.f32 1.0, %v1494_v10 }
 0x331   :  { %v1498_v9 = vpop.eup %1497  ;;  %v1235_v57 = vsel %vm1195_vm14, %v1022_v17, 0.0  ;;  %v909_v49 = vsub.f32 1.0, %v1496_v60  ;;  %v868_v13 = vmul.f32 1.442695, %v802_v24  ;;  %v677_v11 = vpop.xlane.xlu2 %676  ;;  %v1024_v32 = vmul.f32 %v986_v48, %v2336_v33 }
 0x332   :  { %v870_v56 = vmul.f32 1.442695, %v803_v5  ;;  %v685_v14 = vpop.xlane.xlu0 %684  ;;  %v1236_v22 = vadd.f32 %v1235_v57, %v1234_v50  ;;  %v913_v38 = vsub.f32 1.0, %v1498_v9  ;;  %1503 = vpow2.f32 %v860_v8  ;;  %v1500_v35 = vpop.eup %1499 }
 0x333   :  { %v687_v29 = vpop.xlane.xlu1 %686  ;;  %v947_v6 = vmax.f32 %v909_v49, 0.0  ;;  %v725_v63 = vsub.f32 %v409_v16, %v677_v11  ;;  %v1502_v34 = vpop.eup %1501  ;;  %v729_v27 = vsub.f32 %v417_v0, %v685_v14  ;;  %v425_v47 = vmul.f32 0.6931472, %v1500_v35 }
 0x334   :  { %1505 = vpow2.f32 %v870_v56  ;;  %v730_v36 = vsub.f32 %v419_v18, %v687_v29  ;;  %v951_v20 = vmax.f32 %v913_v38, 0.0  ;;  %v423_v42 = vmul.f32 0.6931472, %v1502_v34 }
 0x335   :  { %1507 = vpow2.f32 %v868_v13  ;;  %v985_v25 = vmul.f32 %v947_v6, %v947_v6  ;;  %v2378_v23 = vmax.f32 %v725_v63, 0.0  ;;  %v2383_v55 = vmax.f32 %v729_v27, 0.0  ;;  %v2482_v6 = vld [vmem:[#allocation23_spill] sm:$0xff] }
 0x336   :  { %1509 = vlog2.f32 %v2481_v30  ;;  %v2380_v15 = vmax.f32 %v730_v36, 0.0  ;;  %v1241_v3 = vsel %vm1195_vm14, %v1025_v54, 0.0  ;;  %v952_v41 = vmax.f32 %v914_v31, 0.0 }
 0x337   :  { %v1023_v50 = vmul.f32 %v985_v25, %v2350_v51  ;;  %v801_v7 = vsub.f32 0.0, %v2378_v23  ;;  %1511 = vlog2.f32 %v2080_v21  ;;  %v805_v59 = vsub.f32 0.0, %v2383_v55 }
 0x338   :  { %v806_v26 = vsub.f32 0.0, %v2380_v15  ;;  %v1504_v52 = vpop.eup %1503  ;;  %v1239_v28 = vsel %vm1195_vm14, %v1024_v32, 0.0  ;;  %v989_v40 = vmul.f32 %v951_v20, %v951_v20  ;;  %v990_v5 = vmul.f32 %v952_v41, %v952_v41 }
 0x339   :  { %v1237_v33 = vsel %vm1195_vm14, %v1023_v50, 0.0  ;;  %v912_v62 = vsub.f32 1.0, %v1504_v52  ;;  %v866_v37 = vmul.f32 1.442695, %v801_v7  ;;  %v683_v61 = vpop.xlane.xlu2 %682  ;;  %v874_v43 = vmul.f32 1.442695, %v805_v59 }
 0x33a   :  { %v1506_v39 = vpop.eup %1505  ;;  %v876_v4 = vmul.f32 1.442695, %v806_v26  ;;  %v691_v51 = vpop.xlane.xlu0 %690  ;;  %v1238_v16 = vadd.f32 %v1237_v33, %v1236_v22  ;;  %v728_v17 = vsub.f32 %v2373_v44, %v683_v61  ;;  %v1027_v13 = vmul.f32 %v989_v40, %v2352_v12 }
 0x33b   :  { %v1508_v58 = vpop.eup %1507  ;;  %v693_v21 = vpop.xlane.xlu1 %692  ;;  %v950_v10 = vmax.f32 %v912_v62, 0.0  ;;  %1513 = vpow2.f32 %v866_v37  ;;  %v917_v19 = vsub.f32 1.0, %v1506_v39  ;;  %v732_v56 = vsub.f32 %v423_v42, %v691_v51 }
 0x33c   :  { %v1510_v2 = vpop.eup %1509  ;;  %v916_v18 = vsub.f32 1.0, %v1508_v58  ;;  %v1240_v24 = vadd.f32 %v1239_v28, %v1238_v16  ;;  %1515 = vpow2.f32 %v876_v4  ;;  %v733_v60 = vsub.f32 %v425_v47, %v693_v21 }
 0x33d   :  { %v988_v0 = vmul.f32 %v950_v10, %v950_v10  ;;  %1517 = vpow2.f32 %v874_v43  ;;  %v2394_v8 = vmax.f32 %v728_v17, 0.0  ;;  %v1512_v9 = vpop.eup %1511  ;;  %v421_v22 = vmul.f32 0.6931472, %v1510_v2 }
 0x33e   :  { %v1242_v57 = vadd.f32 %v1241_v3, %v1240_v24  ;;  %v2396_v49 = vmax.f32 %v733_v60, 0.0  ;;  %v954_v14 = vmax.f32 %v916_v18, 0.0  ;;  %v1028_v48 = vmul.f32 %v990_v5, %v2340_v45 }
 0x33f   :  { %v1026_v11 = vmul.f32 %v988_v0, %v2361_v46  ;;  %v804_v44 = vsub.f32 0.0, %v2394_v8  ;;  %v2403_v29 = vmax.f32 %v732_v56, 0.0  ;;  %1519 = vlog2.f32 %v2482_v6 }
 0x340   :  { %v809_v38 = vsub.f32 0.0, %v2396_v49  ;;  %v955_v36 = vmax.f32 %v917_v19, 0.0  ;;  %v429_v46 = vmul.f32 0.6931472, %v1512_v9  ;;  %v1245_v45 = vsel %vm1195_vm14, %v1027_v13, 0.0 }
 0x341   :  { %v1514_v35 = vpop.eup %1513  ;;  %v1243_v63 = vsel %vm1195_vm14, %v1026_v11, 0.0  ;;  %v872_v34 = vmul.f32 1.442695, %v804_v44  ;;  %v689_v12 = vpop.xlane.xlu2 %688  ;;  %v992_v47 = vmul.f32 %v954_v14, %v954_v14  ;;  %v808_v32 = vsub.f32 0.0, %v2403_v29 }
 0x342   :  { %v1516_v54 = vpop.eup %1515  ;;  %v1244_v31 = vadd.f32 %v1243_v63, %v1242_v57  ;;  %v915_v27 = vsub.f32 1.0, %v1514_v35  ;;  %v882_v30 = vmul.f32 1.442695, %v809_v38  ;;  %v697_v20 = vpop.xlane.xlu0 %696  ;;  %v1247_v42 = vsel %vm1195_vm14, %v1028_v48, 0.0 }
 0x343   :  { %v1518_v25 = vpop.eup %1517  ;;  %1521 = vpow2.f32 %v872_v34  ;;  %v993_v52 = vmul.f32 %v955_v36, %v955_v36  ;;  %v920_v3 = vsub.f32 1.0, %v1516_v54  ;;  %v880_v41 = vmul.f32 1.442695, %v808_v32 }
 0x344   :  { %v1246_v50 = vadd.f32 %v1245_v45, %v1244_v31  ;;  %v953_v7 = vmax.f32 %v915_v27, 0.0  ;;  %v919_v26 = vsub.f32 1.0, %v1518_v25  ;;  %v731_v59 = vsub.f32 %v421_v22, %v689_v12 }
 0x345   :  { %1523 = vpow2.f32 %v882_v30  ;;  %v735_v62 = vsub.f32 %v429_v46, %v697_v20  ;;  %v1520_v37 = vpop.eup %1519  ;;  %v1030_v4 = vmul.f32 %v992_v47, %v2366_v53  ;;  %v1031_v40 = vmul.f32 %v993_v52, %v2364_v1 }
 0x346   :  { %v991_v39 = vmul.f32 %v953_v7, %v953_v7  ;;  %v1248_v33 = vadd.f32 %v1247_v42, %v1246_v50  ;;  %1525 = vpow2.f32 %v880_v41  ;;  %v769_v61 = vmax.f32 %v731_v59, 0.0 }
 0x347   :  { %v957_v58 = vmax.f32 %v919_v26, 0.0  ;;  %v2412_v28 = vmax.f32 %v735_v62, 0.0  ;;  %v958_v43 = vmax.f32 %v920_v3, 0.0  ;;  %v427_v10 = vmul.f32 0.6931472, %v1520_v37 }
 0x348   :  { %v1029_v51 = vmul.f32 %v991_v39, %v2378_v23  ;;  %v807_v21 = vsub.f32 0.0, %v769_v61  ;;  %v1251_v53 = vsel %vm1195_vm14, %v1030_v4, 0.0  ;;  %v1253_v1 = vsel %vm1195_vm14, %v1031_v40, 0.0 }
 0x349   :  { %v1522_v16 = vpop.eup %1521  ;;  %v695_v2 = vpop.xlane.xlu2 %694  ;;  %v811_v5 = vsub.f32 0.0, %v2412_v28  ;;  %v995_v0 = vmul.f32 %v957_v58, %v957_v58  ;;  %v996_v11 = vmul.f32 %v958_v43, %v958_v43 }
 0x34a   :  { %v1249_v18 = vsel %vm1195_vm14, %v1029_v51, 0.0  ;;  %v918_v17 = vsub.f32 1.0, %v1522_v16  ;;  %v878_v60 = vmul.f32 1.442695, %v807_v21  ;;  %v734_v57 = vsub.f32 %v427_v10, %v695_v2 }
 0x34b   :  { %v1250_v24 = vadd.f32 %v1249_v18, %v1248_v33  ;;  %v1524_v23 = vpop.eup %1523  ;;  %v886_v9 = vmul.f32 1.442695, %v811_v5  ;;  %v1033_v38 = vmul.f32 %v995_v0, %v2383_v55  ;;  %v1034_v36 = vmul.f32 %v996_v11, %v2380_v15 }
 0x34c   :  { %v956_v19 = vmax.f32 %v918_v17, 0.0  ;;  %v1526_v56 = vpop.eup %1525  ;;  %1527 = vpow2.f32 %v878_v60  ;;  %v772_v22 = vmax.f32 %v734_v57, 0.0  ;;  %v923_v6 = vsub.f32 1.0, %v1524_v23 }
 0x34d   :  { %v1252_v13 = vadd.f32 %v1251_v53, %v1250_v24  ;;  %v922_v44 = vsub.f32 1.0, %v1526_v56  ;;  %1529 = vpow2.f32 %v886_v9  ;;  %v1257_v30 = vsel %vm1195_vm14, %v1033_v38, 0.0 }
 0x34e   :  { %v994_v14 = vmul.f32 %v956_v19, %v956_v19  ;;  %v810_v63 = vsub.f32 0.0, %v772_v22  ;;  %v961_v25 = vmax.f32 %v923_v6, 0.0  ;;  %v2483_v15 = vlaneseq }
 0x34f   :  { %v1254_v48 = vadd.f32 %v1253_v1, %v1252_v13  ;;  %v960_v12 = vmax.f32 %v922_v44, 0.0 }
 0x350   :  { %v1032_v35 = vmul.f32 %v994_v14, %v2394_v8  ;;  %v884_v54 = vmul.f32 1.442695, %v810_v63  ;;  %v1259_v8 = vsel %vm1195_vm14, %v1034_v36, 0.0  ;;  %v1042_v50 = vshrl.u32 %v2483_v15, 7 }
 0x351   :  { %v998_v32 = vmul.f32 %v960_v12, %v960_v12  ;;  %v999_v26 = vmul.f32 %v961_v25, %v961_v25 }
 0x352   :  { %v1255_v34 = vsel %vm1195_vm14, %v1032_v35, 0.0  ;;  %v1528_v46 = vpop.eup %1527  ;;  %1531 = vpow2.f32 %v884_v54  ;;  %v1079_v33 = vadd.s32 296, %v1042_v50 }
 0x353   :  { %v1256_v31 = vadd.f32 %v1255_v34, %v1254_v48  ;;  %v1530_v27 = vpop.eup %1529  ;;  %v921_v45 = vsub.f32 1.0, %v1528_v46  ;;  %v1036_v41 = vmul.f32 %v998_v32, %v2403_v29  ;;  %v1037_v37 = vmul.f32 %v999_v26, %v2396_v49 }
 0x354   :  { %v925_v55 = vsub.f32 1.0, %v1530_v27  ;;  %vm1156_vm8 = vcmp.lt.s32.totalorder %v1079_v33, 300 }
 0x355   :  { %v1258_v47 = vadd.f32 %v1257_v30, %v1256_v31  ;;  %v959_v20 = vmax.f32 %v921_v45, 0.0  ;;  %v1263_v16 = vsel %vm1195_vm14, %v1036_v41, 0.0  ;;  %v1265_v2 = vsel %vm1195_vm14, %v1037_v37, 0.0 }
 0x356   :  { %v963_v7 = vmax.f32 %v925_v55, 0.0 }
 0x357   :  { %v1260_v42 = vadd.f32 %v1259_v8, %v1258_v47  ;;  %v997_v52 = vmul.f32 %v959_v20, %v959_v20 }
 0x358   :  { %v1532_v3 = vpop.eup %1531  ;;  %v1001_v39 = vmul.f32 %v963_v7, %v963_v7 }
 0x359   :  { %v1035_v59 = vmul.f32 %v997_v52, %v769_v61  ;;  %v924_v62 = vsub.f32 1.0, %v1532_v3 }
 0x35a   :  { %v1039_v40 = vmul.f32 %v1001_v39, %v2412_v28 }
 0x35b   :  { %v1261_v4 = vsel %vm1195_vm14, %v1035_v59, 0.0  ;;  %v962_v58 = vmax.f32 %v924_v62, 0.0 }
 0x35c   :  { %v1262_v51 = vadd.f32 %v1261_v4, %v1260_v42  ;;  %v1194_v10 = vsel %vm1156_vm8, %v1039_v40, 0.0 }
 0x35d   :  { %v1000_v21 = vmul.f32 %v962_v58, %v962_v58  ;;  %v1269_v49 = vsel %vm1195_vm14, %v1194_v10, 0.0 }
 0x35e   :  { %v1264_v43 = vadd.f32 %v1263_v16, %v1262_v51 }
 0x35f   :  { %v1038_v29 = vmul.f32 %v1000_v21, %v772_v22 }
 0x360   :  { %v1266_v61 = vadd.f32 %v1265_v2, %v1264_v43 }
 0x361   :  { %v1267_v18 = vsel %vm1195_vm14, %v1038_v29, 0.0 }
 0x362   :  { %v1268_v17 = vadd.f32 %v1267_v18, %v1266_v61 }
 0x364   :  { %v1270_v5 = vadd.f32 %v1269_v49, %v1268_v17 }
 0x366   :  { %1271 = vadd.xlane.f32.xlu1 %v1270_v5 }
 0x3d9   :  { %v1272_v53 = vpop.xlane.xlu1 %1271 }
 0x3da   :  { %v1273_v24 = vrot.slane %v1272_v53, 4 }
 0x3dc   :  { %v1274_v60 = vadd.f32 %v1273_v24, %v1272_v53 }
 0x3de   :  { %v1275_v23 = vrot.slane %v1274_v60, 2 }
 0x3e0   :  { %v1276_v28 = vadd.f32 %v1275_v23, %v1274_v60 }
 0x3e2   :  { %v1277_v0 = vrot.slane %v1276_v28, 1 }
 0x3e4   :  { %v1278_v19 = vadd.f32 %v1277_v0, %v1276_v28 }
 0x3e6   :  { %1298 = vpush %v1278_v19 }
 0x417   :  { %s1299_s22 = spop %1298 }
 0x418   :  { %v1280_v9 = vstv %s1299_s22 }
 0x419   :  { %1281 = vst [vmem:[#allocation2] sm:$0xff] %v1280_v9 }
 0x41a   :  { %1292 = dma.vmem_to_hbm [thread:$0]  %s1288_s21, 128, %s1290_s19, [#allocation3]  }
 0x41b   :  { %1557 = dma.done.wait [#allocation3], 128  }
 0x41c   :  { %1558 = vsyncadd [#allocation3], 4294967168 }
 0x41d   :  { %1297 = vsyncpa [#allocation3], 1 }

</bundles_post_ra>
